<compile_context>
chip_gen: v7x
topology: tpu7x:2x2x1
jax: 0.10.0
libtpu: 0.0.40
codegen_flags: <defaults>
</compile_context>

<pallas_src>
import jax
import jax.numpy as jnp
from jax.experimental import pallas as pl
from jax.experimental.pallas import tpu as pltpu


# --------------------------- fused model kernel ------------------------------
def make_fused_kernel(num_layers, T, B_pad, H):
    def kernel(x_ref, *args):
        # args: [w_ih_t_0, w_hh_t_0, b_0, ..., w_ih_t_{L-1}, w_hh_t_{L-1}, b_{L-1},
        #        w_out, b_out, o_ref, y_sc]
        layer_refs = args[:3 * num_layers]
        w_out_ref = args[3 * num_layers]          # (1, H)
        b_out_ref = args[3 * num_layers + 1]      # (1, 1)
        o_ref = args[3 * num_layers + 2]          # (B_pad, 1)
        y_sc = args[3 * num_layers + 3]           # (T, B_pad, H) inter-layer scratch

        h = None
        for layer in range(num_layers):
            w_ih_t = layer_refs[3 * layer][...]       # (d_in, 4H) lane-dense
            w_hh_t = layer_refs[3 * layer + 1][...]   # (H, 4H)   lane-dense
            b = layer_refs[3 * layer + 2][...]        # (1, 4H)

            if layer == 0:
                inp = x_ref[...]                      # (T, B_pad, D_in)
            else:
                inp = y_sc[...]                       # (T, B_pad, H)
            d_in = inp.shape[-1]

            # Hoisted input projection for ALL timesteps: one matmul + bias.
            gx = jnp.dot(inp.reshape(T * B_pad, d_in), w_ih_t,
                         preferred_element_type=jnp.float32) + b
            gx = gx.reshape(T, B_pad, 4 * H)          # (T, B_pad, 4H)

            h = jnp.zeros((B_pad, H), jnp.float32)
            c = jnp.zeros((B_pad, H), jnp.float32)
            last_layer = (layer == num_layers - 1)

            # Fully unrolled (T is small & static) serial recurrence.
            for t in range(T):
                gates = gx[t] + jnp.dot(h, w_hh_t,
                                        preferred_element_type=jnp.float32)
                sig = jax.nn.sigmoid(gates)           # one full-vreg EUP pass
                th = jnp.tanh(gates)                  # one full-vreg EUP pass
                i_g = sig[:, 0 * H:1 * H]
                f_g = sig[:, 1 * H:2 * H]
                g_g = th[:, 2 * H:3 * H]
                o_g = sig[:, 3 * H:4 * H]
                c = f_g * c + i_g * g_g
                h = o_g * jnp.tanh(c)
                if not last_layer:
                    y_sc[t] = h                       # feed next layer

        # Final Linear on the last timestep's hidden state.
        o_ref[...] = (jnp.sum(h * w_out_ref[...], axis=-1, keepdims=True)
                      + b_out_ref[...])

    return kernel


# ------------------------------ model wrapper --------------------------------
def model_forward(x, params):
    """x: (B, T, 3) batch_first, float32. Returns (B, 1)."""
    B, T, _ = x.shape
    H = params["hidden_size"]
    num_layers = len(params["lstm"])
    B_pad = max(8, ((B + 7) // 8) * 8)                # full sublane group

    x_tm = jnp.transpose(x, (1, 0, 2))                # (T, B, D_in) time-major
    if B_pad != B:
        x_tm = jnp.pad(x_tm, ((0, 0), (0, B_pad - B), (0, 0)))

    args = [x_tm]
    for (w_ih_t, w_hh_t, b) in params["lstm"]:        # already pre-transposed
        args += [w_ih_t, w_hh_t, b]
    args += [params["w_out"], params["b_out"]]

    out_pad = pl.pallas_call(
        make_fused_kernel(num_layers, T, B_pad, H),
        out_shape=jax.ShapeDtypeStruct((B_pad, 1), jnp.float32),
        in_specs=[pl.BlockSpec(memory_space=pltpu.MemorySpace.VMEM)] * len(args),
        out_specs=pl.BlockSpec(memory_space=pltpu.MemorySpace.VMEM),
        scratch_shapes=[pltpu.VMEM((T, B_pad, H), jnp.float32)],
    )(*args)
    return out_pad[:B, :]


def init_params(key, input_size, hidden_size, num_layers):
    """Weights stored pre-transposed (lane-dense last dim = 4H)."""
    params = {"hidden_size": hidden_size, "lstm": []}
    bound = 1.0 / float(jnp.sqrt(jnp.float32(hidden_size)))
    for layer in range(num_layers):
        d_in = input_size if layer == 0 else hidden_size
        key, k1, k2, k3, k4 = jax.random.split(key, 5)
        w_ih = jax.random.uniform(k1, (4 * hidden_size, d_in), jnp.float32, -bound, bound)
        w_hh = jax.random.uniform(k2, (4 * hidden_size, hidden_size), jnp.float32, -bound, bound)
        b_ih = jax.random.uniform(k3, (4 * hidden_size,), jnp.float32, -bound, bound)
        b_hh = jax.random.uniform(k4, (4 * hidden_size,), jnp.float32, -bound, bound)
        params["lstm"].append(
            (jnp.asarray(w_ih.T), jnp.asarray(w_hh.T),
             (b_ih + b_hh).reshape(1, 4 * hidden_size)))
    key, k1, k2 = jax.random.split(key, 3)
    params["w_out"] = jax.random.uniform(k1, (1, hidden_size), jnp.float32, -bound, bound)
    params["b_out"] = jax.random.uniform(k2, (1, 1), jnp.float32, -bound, bound)
    return params


# ------------------------- pure-JAX reference (check) ------------------------
def reference_forward(x, params):
    H = params["hidden_size"]
    B, T, _ = x.shape
    inp = x
    for (w_ih_t, w_hh_t, b) in params["lstm"]:
        h = jnp.zeros((B, H), jnp.float32)
        c = jnp.zeros((B, H), jnp.float32)
        outs = []
        for t in range(T):
            gates = inp[:, t, :] @ w_ih_t + h @ w_hh_t + b
            i = jax.nn.sigmoid(gates[:, 0 * H:1 * H])
            f = jax.nn.sigmoid(gates[:, 1 * H:2 * H])
            g = jnp.tanh(gates[:, 2 * H:3 * H])
            o = jax.nn.sigmoid(gates[:, 3 * H:4 * H])
            c = f * c + i * g
            h = o * jnp.tanh(c)
            outs.append(h)
        inp = jnp.stack(outs, axis=1)
    return inp[:, -1, :] @ params["w_out"].T + params["b_out"]


if __name__ == "__main__":
    B, T, D_IN = 2, 8, 3
    HIDDEN, NUM_LAYERS = 32, 2

    key = jax.random.PRNGKey(0)
    key_params, key_x = jax.random.split(key)
    params = init_params(key_params, D_IN, HIDDEN, NUM_LAYERS)
    x = jax.random.normal(key_x, (B, T, D_IN), jnp.float32)

    out = model_forward(x, params)
    out = jax.block_until_ready(out)

    ref = reference_forward(x, params)
    assert out.shape == (B, 1), out.shape
    assert jnp.allclose(out, ref, atol=1e-5, rtol=1e-5), (out, ref)

    print("KERNEL_OK")
</pallas_src>

<mosaic_0001>
module attributes {stable_mosaic.version = 11 : i64} {
  func.func @kernel(%arg0: memref<8x8x3xf32, #tpu.memory_space<vmem>>, %arg1: memref<3x128xf32, #tpu.memory_space<vmem>>, %arg2: memref<32x128xf32, #tpu.memory_space<vmem>>, %arg3: memref<1x128xf32, #tpu.memory_space<vmem>>, %arg4: memref<32x128xf32, #tpu.memory_space<vmem>>, %arg5: memref<32x128xf32, #tpu.memory_space<vmem>>, %arg6: memref<1x128xf32, #tpu.memory_space<vmem>>, %arg7: memref<1x32xf32, #tpu.memory_space<vmem>>, %arg8: memref<1x1xf32, #tpu.memory_space<vmem>>, %arg9: memref<8x1xf32, #tpu.memory_space<vmem>>, %arg10: memref<8x8x32xf32, #tpu.memory_space<vmem>>) attributes {dimension_semantics = [], scalar_prefetch = 0 : i64, scratch_operands = 1 : i64, tpu.core_type = #tpu.core_type<tc>} {
    %c0 = arith.constant 0 : index
    %c0_0 = arith.constant 0 : index
    %0 = vector.load %arg1[%c0, %c0_0] : memref<3x128xf32, #tpu.memory_space<vmem>>, vector<3x128xf32>
    %c0_1 = arith.constant 0 : index
    %c0_2 = arith.constant 0 : index
    %1 = vector.load %arg2[%c0_1, %c0_2] : memref<32x128xf32, #tpu.memory_space<vmem>>, vector<32x128xf32>
    %c0_3 = arith.constant 0 : index
    %c0_4 = arith.constant 0 : index
    %2 = vector.load %arg3[%c0_3, %c0_4] : memref<1x128xf32, #tpu.memory_space<vmem>>, vector<1x128xf32>
    %c0_5 = arith.constant 0 : index
    %c0_6 = arith.constant 0 : index
    %c0_7 = arith.constant 0 : index
    %3 = vector.load %arg0[%c0_5, %c0_6, %c0_7] : memref<8x8x3xf32, #tpu.memory_space<vmem>>, vector<8x8x3xf32>
    %4 = vector.shape_cast %3 : vector<8x8x3xf32> to vector<64x3xf32>
    %cst = arith.constant dense<0.000000e+00> : vector<64x128xf32>
    %5 = tpu.matmul %4, %0, %cst {dimension_numbers = #tpu.dot_dimension_numbers<[1], [0], [0], [1], [0, 0, 1, 1], [], []>} : vector<64x3xf32>, vector<3x128xf32>, vector<64x128xf32> -> vector<64x128xf32>
    %6 = vector.broadcast %2 : vector<1x128xf32> to vector<64x128xf32>
    %7 = arith.addf %5, %6 : vector<64x128xf32>
    %8 = vector.shape_cast %7 : vector<64x128xf32> to vector<8x8x128xf32>
    %cst_8 = arith.constant 0.000000e+00 : f32
    %9 = vector.broadcast %cst_8 : f32 to vector<8x32xf32>
    %cst_9 = arith.constant 0.000000e+00 : f32
    %10 = vector.broadcast %cst_9 : f32 to vector<8x32xf32>
    %11 = vector.extract_strided_slice %8 {offsets = [0, 0, 0], sizes = [1, 8, 128], strides = [1, 1, 1]} : vector<8x8x128xf32> to vector<1x8x128xf32>
    %12 = vector.shape_cast %11 : vector<1x8x128xf32> to vector<8x128xf32>
    %cst_10 = arith.constant dense<0.000000e+00> : vector<8x128xf32>
    %13 = tpu.matmul %9, %1, %cst_10 {dimension_numbers = #tpu.dot_dimension_numbers<[1], [0], [0], [1], [0, 0, 1, 1], [], []>} : vector<8x32xf32>, vector<32x128xf32>, vector<8x128xf32> -> vector<8x128xf32>
    %14 = arith.addf %12, %13 : vector<8x128xf32>
    %15 = arith.negf %14 : vector<8x128xf32>
    %16 = math.exp %15 : vector<8x128xf32>
    %cst_11 = arith.constant 1.000000e+00 : f32
    %17 = vector.broadcast %cst_11 : f32 to vector<8x128xf32>
    %18 = arith.addf %17, %16 : vector<8x128xf32>
    %19 = arith.divf %17, %18 : vector<8x128xf32>
    %20 = math.tanh %14 : vector<8x128xf32>
    %21 = vector.extract_strided_slice %19 {offsets = [0, 0], sizes = [8, 32], strides = [1, 1]} : vector<8x128xf32> to vector<8x32xf32>
    %22 = vector.extract_strided_slice %19 {offsets = [0, 32], sizes = [8, 32], strides = [1, 1]} : vector<8x128xf32> to vector<8x32xf32>
    %23 = vector.extract_strided_slice %20 {offsets = [0, 64], sizes = [8, 32], strides = [1, 1]} : vector<8x128xf32> to vector<8x32xf32>
    %24 = vector.extract_strided_slice %19 {offsets = [0, 96], sizes = [8, 32], strides = [1, 1]} : vector<8x128xf32> to vector<8x32xf32>
    %25 = arith.mulf %22, %10 : vector<8x32xf32>
    %26 = arith.mulf %21, %23 : vector<8x32xf32>
    %27 = arith.addf %25, %26 : vector<8x32xf32>
    %28 = math.tanh %27 : vector<8x32xf32>
    %29 = arith.mulf %24, %28 : vector<8x32xf32>
    %c0_12 = arith.constant 0 : index
    %c0_13 = arith.constant 0 : index
    %c0_14 = arith.constant 0 : index
    %30 = vector.load %arg10[%c0_12, %c0_13, %c0_14] : memref<8x8x32xf32, #tpu.memory_space<vmem>>, vector<1x8x32xf32>
    %31 = vector.shape_cast %30 : vector<1x8x32xf32> to vector<8x32xf32>
    %32 = vector.shape_cast %29 : vector<8x32xf32> to vector<1x8x32xf32>
    tpu.vector_store %arg10[%c0_12, %c0_13, %c0_14], %32 {strides = array<i32>} : memref<8x8x32xf32, #tpu.memory_space<vmem>>, vector<1x8x32xf32>,
    %33 = vector.extract_strided_slice %8 {offsets = [1, 0, 0], sizes = [1, 8, 128], strides = [1, 1, 1]} : vector<8x8x128xf32> to vector<1x8x128xf32>
    %34 = vector.shape_cast %33 : vector<1x8x128xf32> to vector<8x128xf32>
    %cst_15 = arith.constant dense<0.000000e+00> : vector<8x128xf32>
    %35 = tpu.matmul %29, %1, %cst_15 {dimension_numbers = #tpu.dot_dimension_numbers<[1], [0], [0], [1], [0, 0, 1, 1], [], []>} : vector<8x32xf32>, vector<32x128xf32>, vector<8x128xf32> -> vector<8x128xf32>
    %36 = arith.addf %34, %35 : vector<8x128xf32>
    %37 = arith.negf %36 : vector<8x128xf32>
    %38 = math.exp %37 : vector<8x128xf32>
    %cst_16 = arith.constant 1.000000e+00 : f32
    %39 = vector.broadcast %cst_16 : f32 to vector<8x128xf32>
    %40 = arith.addf %39, %38 : vector<8x128xf32>
    %41 = arith.divf %39, %40 : vector<8x128xf32>
    %42 = math.tanh %36 : vector<8x128xf32>
    %43 = vector.extract_strided_slice %41 {offsets = [0, 0], sizes = [8, 32], strides = [1, 1]} : vector<8x128xf32> to vector<8x32xf32>
    %44 = vector.extract_strided_slice %41 {offsets = [0, 32], sizes = [8, 32], strides = [1, 1]} : vector<8x128xf32> to vector<8x32xf32>
    %45 = vector.extract_strided_slice %42 {offsets = [0, 64], sizes = [8, 32], strides = [1, 1]} : vector<8x128xf32> to vector<8x32xf32>
    %46 = vector.extract_strided_slice %41 {offsets = [0, 96], sizes = [8, 32], strides = [1, 1]} : vector<8x128xf32> to vector<8x32xf32>
    %47 = arith.mulf %44, %27 : vector<8x32xf32>
    %48 = arith.mulf %43, %45 : vector<8x32xf32>
    %49 = arith.addf %47, %48 : vector<8x32xf32>
    %50 = math.tanh %49 : vector<8x32xf32>
    %51 = arith.mulf %46, %50 : vector<8x32xf32>
    %c1 = arith.constant 1 : index
    %c0_17 = arith.constant 0 : index
    %c0_18 = arith.constant 0 : index
    %52 = vector.load %arg10[%c1, %c0_17, %c0_18] : memref<8x8x32xf32, #tpu.memory_space<vmem>>, vector<1x8x32xf32>
    %53 = vector.shape_cast %52 : vector<1x8x32xf32> to vector<8x32xf32>
    %54 = vector.shape_cast %51 : vector<8x32xf32> to vector<1x8x32xf32>
    tpu.vector_store %arg10[%c1, %c0_17, %c0_18], %54 {strides = array<i32>} : memref<8x8x32xf32, #tpu.memory_space<vmem>>, vector<1x8x32xf32>,
    %55 = vector.extract_strided_slice %8 {offsets = [2, 0, 0], sizes = [1, 8, 128], strides = [1, 1, 1]} : vector<8x8x128xf32> to vector<1x8x128xf32>
    %56 = vector.shape_cast %55 : vector<1x8x128xf32> to vector<8x128xf32>
    %cst_19 = arith.constant dense<0.000000e+00> : vector<8x128xf32>
    %57 = tpu.matmul %51, %1, %cst_19 {dimension_numbers = #tpu.dot_dimension_numbers<[1], [0], [0], [1], [0, 0, 1, 1], [], []>} : vector<8x32xf32>, vector<32x128xf32>, vector<8x128xf32> -> vector<8x128xf32>
    %58 = arith.addf %56, %57 : vector<8x128xf32>
    %59 = arith.negf %58 : vector<8x128xf32>
    %60 = math.exp %59 : vector<8x128xf32>
    %cst_20 = arith.constant 1.000000e+00 : f32
    %61 = vector.broadcast %cst_20 : f32 to vector<8x128xf32>
    %62 = arith.addf %61, %60 : vector<8x128xf32>
    %63 = arith.divf %61, %62 : vector<8x128xf32>
    %64 = math.tanh %58 : vector<8x128xf32>
    %65 = vector.extract_strided_slice %63 {offsets = [0, 0], sizes = [8, 32], strides = [1, 1]} : vector<8x128xf32> to vector<8x32xf32>
    %66 = vector.extract_strided_slice %63 {offsets = [0, 32], sizes = [8, 32], strides = [1, 1]} : vector<8x128xf32> to vector<8x32xf32>
    %67 = vector.extract_strided_slice %64 {offsets = [0, 64], sizes = [8, 32], strides = [1, 1]} : vector<8x128xf32> to vector<8x32xf32>
    %68 = vector.extract_strided_slice %63 {offsets = [0, 96], sizes = [8, 32], strides = [1, 1]} : vector<8x128xf32> to vector<8x32xf32>
    %69 = arith.mulf %66, %49 : vector<8x32xf32>
    %70 = arith.mulf %65, %67 : vector<8x32xf32>
    %71 = arith.addf %69, %70 : vector<8x32xf32>
    %72 = math.tanh %71 : vector<8x32xf32>
    %73 = arith.mulf %68, %72 : vector<8x32xf32>
    %c2 = arith.constant 2 : index
    %c0_21 = arith.constant 0 : index
    %c0_22 = arith.constant 0 : index
    %74 = vector.load %arg10[%c2, %c0_21, %c0_22] : memref<8x8x32xf32, #tpu.memory_space<vmem>>, vector<1x8x32xf32>
    %75 = vector.shape_cast %74 : vector<1x8x32xf32> to vector<8x32xf32>
    %76 = vector.shape_cast %73 : vector<8x32xf32> to vector<1x8x32xf32>
    tpu.vector_store %arg10[%c2, %c0_21, %c0_22], %76 {strides = array<i32>} : memref<8x8x32xf32, #tpu.memory_space<vmem>>, vector<1x8x32xf32>,
    %77 = vector.extract_strided_slice %8 {offsets = [3, 0, 0], sizes = [1, 8, 128], strides = [1, 1, 1]} : vector<8x8x128xf32> to vector<1x8x128xf32>
    %78 = vector.shape_cast %77 : vector<1x8x128xf32> to vector<8x128xf32>
    %cst_23 = arith.constant dense<0.000000e+00> : vector<8x128xf32>
    %79 = tpu.matmul %73, %1, %cst_23 {dimension_numbers = #tpu.dot_dimension_numbers<[1], [0], [0], [1], [0, 0, 1, 1], [], []>} : vector<8x32xf32>, vector<32x128xf32>, vector<8x128xf32> -> vector<8x128xf32>
    %80 = arith.addf %78, %79 : vector<8x128xf32>
    %81 = arith.negf %80 : vector<8x128xf32>
    %82 = math.exp %81 : vector<8x128xf32>
    %cst_24 = arith.constant 1.000000e+00 : f32
    %83 = vector.broadcast %cst_24 : f32 to vector<8x128xf32>
    %84 = arith.addf %83, %82 : vector<8x128xf32>
    %85 = arith.divf %83, %84 : vector<8x128xf32>
    %86 = math.tanh %80 : vector<8x128xf32>
    %87 = vector.extract_strided_slice %85 {offsets = [0, 0], sizes = [8, 32], strides = [1, 1]} : vector<8x128xf32> to vector<8x32xf32>
    %88 = vector.extract_strided_slice %85 {offsets = [0, 32], sizes = [8, 32], strides = [1, 1]} : vector<8x128xf32> to vector<8x32xf32>
    %89 = vector.extract_strided_slice %86 {offsets = [0, 64], sizes = [8, 32], strides = [1, 1]} : vector<8x128xf32> to vector<8x32xf32>
    %90 = vector.extract_strided_slice %85 {offsets = [0, 96], sizes = [8, 32], strides = [1, 1]} : vector<8x128xf32> to vector<8x32xf32>
    %91 = arith.mulf %88, %71 : vector<8x32xf32>
    %92 = arith.mulf %87, %89 : vector<8x32xf32>
    %93 = arith.addf %91, %92 : vector<8x32xf32>
    %94 = math.tanh %93 : vector<8x32xf32>
    %95 = arith.mulf %90, %94 : vector<8x32xf32>
    %c3 = arith.constant 3 : index
    %c0_25 = arith.constant 0 : index
    %c0_26 = arith.constant 0 : index
    %96 = vector.load %arg10[%c3, %c0_25, %c0_26] : memref<8x8x32xf32, #tpu.memory_space<vmem>>, vector<1x8x32xf32>
    %97 = vector.shape_cast %96 : vector<1x8x32xf32> to vector<8x32xf32>
    %98 = vector.shape_cast %95 : vector<8x32xf32> to vector<1x8x32xf32>
    tpu.vector_store %arg10[%c3, %c0_25, %c0_26], %98 {strides = array<i32>} : memref<8x8x32xf32, #tpu.memory_space<vmem>>, vector<1x8x32xf32>,
    %99 = vector.extract_strided_slice %8 {offsets = [4, 0, 0], sizes = [1, 8, 128], strides = [1, 1, 1]} : vector<8x8x128xf32> to vector<1x8x128xf32>
    %100 = vector.shape_cast %99 : vector<1x8x128xf32> to vector<8x128xf32>
    %cst_27 = arith.constant dense<0.000000e+00> : vector<8x128xf32>
    %101 = tpu.matmul %95, %1, %cst_27 {dimension_numbers = #tpu.dot_dimension_numbers<[1], [0], [0], [1], [0, 0, 1, 1], [], []>} : vector<8x32xf32>, vector<32x128xf32>, vector<8x128xf32> -> vector<8x128xf32>
    %102 = arith.addf %100, %101 : vector<8x128xf32>
    %103 = arith.negf %102 : vector<8x128xf32>
    %104 = math.exp %103 : vector<8x128xf32>
    %cst_28 = arith.constant 1.000000e+00 : f32
    %105 = vector.broadcast %cst_28 : f32 to vector<8x128xf32>
    %106 = arith.addf %105, %104 : vector<8x128xf32>
    %107 = arith.divf %105, %106 : vector<8x128xf32>
    %108 = math.tanh %102 : vector<8x128xf32>
    %109 = vector.extract_strided_slice %107 {offsets = [0, 0], sizes = [8, 32], strides = [1, 1]} : vector<8x128xf32> to vector<8x32xf32>
    %110 = vector.extract_strided_slice %107 {offsets = [0, 32], sizes = [8, 32], strides = [1, 1]} : vector<8x128xf32> to vector<8x32xf32>
    %111 = vector.extract_strided_slice %108 {offsets = [0, 64], sizes = [8, 32], strides = [1, 1]} : vector<8x128xf32> to vector<8x32xf32>
    %112 = vector.extract_strided_slice %107 {offsets = [0, 96], sizes = [8, 32], strides = [1, 1]} : vector<8x128xf32> to vector<8x32xf32>
    %113 = arith.mulf %110, %93 : vector<8x32xf32>
    %114 = arith.mulf %109, %111 : vector<8x32xf32>
    %115 = arith.addf %113, %114 : vector<8x32xf32>
    %116 = math.tanh %115 : vector<8x32xf32>
    %117 = arith.mulf %112, %116 : vector<8x32xf32>
    %c4 = arith.constant 4 : index
    %c0_29 = arith.constant 0 : index
    %c0_30 = arith.constant 0 : index
    %118 = vector.load %arg10[%c4, %c0_29, %c0_30] : memref<8x8x32xf32, #tpu.memory_space<vmem>>, vector<1x8x32xf32>
    %119 = vector.shape_cast %118 : vector<1x8x32xf32> to vector<8x32xf32>
    %120 = vector.shape_cast %117 : vector<8x32xf32> to vector<1x8x32xf32>
    tpu.vector_store %arg10[%c4, %c0_29, %c0_30], %120 {strides = array<i32>} : memref<8x8x32xf32, #tpu.memory_space<vmem>>, vector<1x8x32xf32>,
    %121 = vector.extract_strided_slice %8 {offsets = [5, 0, 0], sizes = [1, 8, 128], strides = [1, 1, 1]} : vector<8x8x128xf32> to vector<1x8x128xf32>
    %122 = vector.shape_cast %121 : vector<1x8x128xf32> to vector<8x128xf32>
    %cst_31 = arith.constant dense<0.000000e+00> : vector<8x128xf32>
    %123 = tpu.matmul %117, %1, %cst_31 {dimension_numbers = #tpu.dot_dimension_numbers<[1], [0], [0], [1], [0, 0, 1, 1], [], []>} : vector<8x32xf32>, vector<32x128xf32>, vector<8x128xf32> -> vector<8x128xf32>
    %124 = arith.addf %122, %123 : vector<8x128xf32>
    %125 = arith.negf %124 : vector<8x128xf32>
    %126 = math.exp %125 : vector<8x128xf32>
    %cst_32 = arith.constant 1.000000e+00 : f32
    %127 = vector.broadcast %cst_32 : f32 to vector<8x128xf32>
    %128 = arith.addf %127, %126 : vector<8x128xf32>
    %129 = arith.divf %127, %128 : vector<8x128xf32>
    %130 = math.tanh %124 : vector<8x128xf32>
    %131 = vector.extract_strided_slice %129 {offsets = [0, 0], sizes = [8, 32], strides = [1, 1]} : vector<8x128xf32> to vector<8x32xf32>
    %132 = vector.extract_strided_slice %129 {offsets = [0, 32], sizes = [8, 32], strides = [1, 1]} : vector<8x128xf32> to vector<8x32xf32>
    %133 = vector.extract_strided_slice %130 {offsets = [0, 64], sizes = [8, 32], strides = [1, 1]} : vector<8x128xf32> to vector<8x32xf32>
    %134 = vector.extract_strided_slice %129 {offsets = [0, 96], sizes = [8, 32], strides = [1, 1]} : vector<8x128xf32> to vector<8x32xf32>
    %135 = arith.mulf %132, %115 : vector<8x32xf32>
    %136 = arith.mulf %131, %133 : vector<8x32xf32>
    %137 = arith.addf %135, %136 : vector<8x32xf32>
    %138 = math.tanh %137 : vector<8x32xf32>
    %139 = arith.mulf %134, %138 : vector<8x32xf32>
    %c5 = arith.constant 5 : index
    %c0_33 = arith.constant 0 : index
    %c0_34 = arith.constant 0 : index
    %140 = vector.load %arg10[%c5, %c0_33, %c0_34] : memref<8x8x32xf32, #tpu.memory_space<vmem>>, vector<1x8x32xf32>
    %141 = vector.shape_cast %140 : vector<1x8x32xf32> to vector<8x32xf32>
    %142 = vector.shape_cast %139 : vector<8x32xf32> to vector<1x8x32xf32>
    tpu.vector_store %arg10[%c5, %c0_33, %c0_34], %142 {strides = array<i32>} : memref<8x8x32xf32, #tpu.memory_space<vmem>>, vector<1x8x32xf32>,
    %143 = vector.extract_strided_slice %8 {offsets = [6, 0, 0], sizes = [1, 8, 128], strides = [1, 1, 1]} : vector<8x8x128xf32> to vector<1x8x128xf32>
    %144 = vector.shape_cast %143 : vector<1x8x128xf32> to vector<8x128xf32>
    %cst_35 = arith.constant dense<0.000000e+00> : vector<8x128xf32>
    %145 = tpu.matmul %139, %1, %cst_35 {dimension_numbers = #tpu.dot_dimension_numbers<[1], [0], [0], [1], [0, 0, 1, 1], [], []>} : vector<8x32xf32>, vector<32x128xf32>, vector<8x128xf32> -> vector<8x128xf32>
    %146 = arith.addf %144, %145 : vector<8x128xf32>
    %147 = arith.negf %146 : vector<8x128xf32>
    %148 = math.exp %147 : vector<8x128xf32>
    %cst_36 = arith.constant 1.000000e+00 : f32
    %149 = vector.broadcast %cst_36 : f32 to vector<8x128xf32>
    %150 = arith.addf %149, %148 : vector<8x128xf32>
    %151 = arith.divf %149, %150 : vector<8x128xf32>
    %152 = math.tanh %146 : vector<8x128xf32>
    %153 = vector.extract_strided_slice %151 {offsets = [0, 0], sizes = [8, 32], strides = [1, 1]} : vector<8x128xf32> to vector<8x32xf32>
    %154 = vector.extract_strided_slice %151 {offsets = [0, 32], sizes = [8, 32], strides = [1, 1]} : vector<8x128xf32> to vector<8x32xf32>
    %155 = vector.extract_strided_slice %152 {offsets = [0, 64], sizes = [8, 32], strides = [1, 1]} : vector<8x128xf32> to vector<8x32xf32>
    %156 = vector.extract_strided_slice %151 {offsets = [0, 96], sizes = [8, 32], strides = [1, 1]} : vector<8x128xf32> to vector<8x32xf32>
    %157 = arith.mulf %154, %137 : vector<8x32xf32>
    %158 = arith.mulf %153, %155 : vector<8x32xf32>
    %159 = arith.addf %157, %158 : vector<8x32xf32>
    %160 = math.tanh %159 : vector<8x32xf32>
    %161 = arith.mulf %156, %160 : vector<8x32xf32>
    %c6 = arith.constant 6 : index
    %c0_37 = arith.constant 0 : index
    %c0_38 = arith.constant 0 : index
    %162 = vector.load %arg10[%c6, %c0_37, %c0_38] : memref<8x8x32xf32, #tpu.memory_space<vmem>>, vector<1x8x32xf32>
    %163 = vector.shape_cast %162 : vector<1x8x32xf32> to vector<8x32xf32>
    %164 = vector.shape_cast %161 : vector<8x32xf32> to vector<1x8x32xf32>
    tpu.vector_store %arg10[%c6, %c0_37, %c0_38], %164 {strides = array<i32>} : memref<8x8x32xf32, #tpu.memory_space<vmem>>, vector<1x8x32xf32>,
    %165 = vector.extract_strided_slice %8 {offsets = [7, 0, 0], sizes = [1, 8, 128], strides = [1, 1, 1]} : vector<8x8x128xf32> to vector<1x8x128xf32>
    %166 = vector.shape_cast %165 : vector<1x8x128xf32> to vector<8x128xf32>
    %cst_39 = arith.constant dense<0.000000e+00> : vector<8x128xf32>
    %167 = tpu.matmul %161, %1, %cst_39 {dimension_numbers = #tpu.dot_dimension_numbers<[1], [0], [0], [1], [0, 0, 1, 1], [], []>} : vector<8x32xf32>, vector<32x128xf32>, vector<8x128xf32> -> vector<8x128xf32>
    %168 = arith.addf %166, %167 : vector<8x128xf32>
    %169 = arith.negf %168 : vector<8x128xf32>
    %170 = math.exp %169 : vector<8x128xf32>
    %cst_40 = arith.constant 1.000000e+00 : f32
    %171 = vector.broadcast %cst_40 : f32 to vector<8x128xf32>
    %172 = arith.addf %171, %170 : vector<8x128xf32>
    %173 = arith.divf %171, %172 : vector<8x128xf32>
    %174 = math.tanh %168 : vector<8x128xf32>
    %175 = vector.extract_strided_slice %173 {offsets = [0, 0], sizes = [8, 32], strides = [1, 1]} : vector<8x128xf32> to vector<8x32xf32>
    %176 = vector.extract_strided_slice %173 {offsets = [0, 32], sizes = [8, 32], strides = [1, 1]} : vector<8x128xf32> to vector<8x32xf32>
    %177 = vector.extract_strided_slice %174 {offsets = [0, 64], sizes = [8, 32], strides = [1, 1]} : vector<8x128xf32> to vector<8x32xf32>
    %178 = vector.extract_strided_slice %173 {offsets = [0, 96], sizes = [8, 32], strides = [1, 1]} : vector<8x128xf32> to vector<8x32xf32>
    %179 = arith.mulf %176, %159 : vector<8x32xf32>
    %180 = arith.mulf %175, %177 : vector<8x32xf32>
    %181 = arith.addf %179, %180 : vector<8x32xf32>
    %182 = math.tanh %181 : vector<8x32xf32>
    %183 = arith.mulf %178, %182 : vector<8x32xf32>
    %c7 = arith.constant 7 : index
    %c0_41 = arith.constant 0 : index
    %c0_42 = arith.constant 0 : index
    %184 = vector.load %arg10[%c7, %c0_41, %c0_42] : memref<8x8x32xf32, #tpu.memory_space<vmem>>, vector<1x8x32xf32>
    %185 = vector.shape_cast %184 : vector<1x8x32xf32> to vector<8x32xf32>
    %186 = vector.shape_cast %183 : vector<8x32xf32> to vector<1x8x32xf32>
    tpu.vector_store %arg10[%c7, %c0_41, %c0_42], %186 {strides = array<i32>} : memref<8x8x32xf32, #tpu.memory_space<vmem>>, vector<1x8x32xf32>,
    %c0_43 = arith.constant 0 : index
    %c0_44 = arith.constant 0 : index
    %187 = vector.load %arg4[%c0_43, %c0_44] : memref<32x128xf32, #tpu.memory_space<vmem>>, vector<32x128xf32>
    %c0_45 = arith.constant 0 : index
    %c0_46 = arith.constant 0 : index
    %188 = vector.load %arg5[%c0_45, %c0_46] : memref<32x128xf32, #tpu.memory_space<vmem>>, vector<32x128xf32>
    %c0_47 = arith.constant 0 : index
    %c0_48 = arith.constant 0 : index
    %189 = vector.load %arg6[%c0_47, %c0_48] : memref<1x128xf32, #tpu.memory_space<vmem>>, vector<1x128xf32>
    %c0_49 = arith.constant 0 : index
    %c0_50 = arith.constant 0 : index
    %c0_51 = arith.constant 0 : index
    %190 = vector.load %arg10[%c0_49, %c0_50, %c0_51] : memref<8x8x32xf32, #tpu.memory_space<vmem>>, vector<8x8x32xf32>
    %191 = vector.shape_cast %190 : vector<8x8x32xf32> to vector<64x32xf32>
    %cst_52 = arith.constant dense<0.000000e+00> : vector<64x128xf32>
    %192 = tpu.matmul %191, %187, %cst_52 {dimension_numbers = #tpu.dot_dimension_numbers<[1], [0], [0], [1], [0, 0, 1, 1], [], []>} : vector<64x32xf32>, vector<32x128xf32>, vector<64x128xf32> -> vector<64x128xf32>
    %193 = vector.broadcast %189 : vector<1x128xf32> to vector<64x128xf32>
    %194 = arith.addf %192, %193 : vector<64x128xf32>
    %195 = vector.shape_cast %194 : vector<64x128xf32> to vector<8x8x128xf32>
    %cst_53 = arith.constant 0.000000e+00 : f32
    %196 = vector.broadcast %cst_53 : f32 to vector<8x32xf32>
    %cst_54 = arith.constant 0.000000e+00 : f32
    %197 = vector.broadcast %cst_54 : f32 to vector<8x32xf32>
    %198 = vector.extract_strided_slice %195 {offsets = [0, 0, 0], sizes = [1, 8, 128], strides = [1, 1, 1]} : vector<8x8x128xf32> to vector<1x8x128xf32>
    %199 = vector.shape_cast %198 : vector<1x8x128xf32> to vector<8x128xf32>
    %cst_55 = arith.constant dense<0.000000e+00> : vector<8x128xf32>
    %200 = tpu.matmul %196, %188, %cst_55 {dimension_numbers = #tpu.dot_dimension_numbers<[1], [0], [0], [1], [0, 0, 1, 1], [], []>} : vector<8x32xf32>, vector<32x128xf32>, vector<8x128xf32> -> vector<8x128xf32>
    %201 = arith.addf %199, %200 : vector<8x128xf32>
    %202 = arith.negf %201 : vector<8x128xf32>
    %203 = math.exp %202 : vector<8x128xf32>
    %cst_56 = arith.constant 1.000000e+00 : f32
    %204 = vector.broadcast %cst_56 : f32 to vector<8x128xf32>
    %205 = arith.addf %204, %203 : vector<8x128xf32>
    %206 = arith.divf %204, %205 : vector<8x128xf32>
    %207 = math.tanh %201 : vector<8x128xf32>
    %208 = vector.extract_strided_slice %206 {offsets = [0, 0], sizes = [8, 32], strides = [1, 1]} : vector<8x128xf32> to vector<8x32xf32>
    %209 = vector.extract_strided_slice %206 {offsets = [0, 32], sizes = [8, 32], strides = [1, 1]} : vector<8x128xf32> to vector<8x32xf32>
    %210 = vector.extract_strided_slice %207 {offsets = [0, 64], sizes = [8, 32], strides = [1, 1]} : vector<8x128xf32> to vector<8x32xf32>
    %211 = vector.extract_strided_slice %206 {offsets = [0, 96], sizes = [8, 32], strides = [1, 1]} : vector<8x128xf32> to vector<8x32xf32>
    %212 = arith.mulf %209, %197 : vector<8x32xf32>
    %213 = arith.mulf %208, %210 : vector<8x32xf32>
    %214 = arith.addf %212, %213 : vector<8x32xf32>
    %215 = math.tanh %214 : vector<8x32xf32>
    %216 = arith.mulf %211, %215 : vector<8x32xf32>
    %217 = vector.extract_strided_slice %195 {offsets = [1, 0, 0], sizes = [1, 8, 128], strides = [1, 1, 1]} : vector<8x8x128xf32> to vector<1x8x128xf32>
    %218 = vector.shape_cast %217 : vector<1x8x128xf32> to vector<8x128xf32>
    %cst_57 = arith.constant dense<0.000000e+00> : vector<8x128xf32>
    %219 = tpu.matmul %216, %188, %cst_57 {dimension_numbers = #tpu.dot_dimension_numbers<[1], [0], [0], [1], [0, 0, 1, 1], [], []>} : vector<8x32xf32>, vector<32x128xf32>, vector<8x128xf32> -> vector<8x128xf32>
    %220 = arith.addf %218, %219 : vector<8x128xf32>
    %221 = arith.negf %220 : vector<8x128xf32>
    %222 = math.exp %221 : vector<8x128xf32>
    %cst_58 = arith.constant 1.000000e+00 : f32
    %223 = vector.broadcast %cst_58 : f32 to vector<8x128xf32>
    %224 = arith.addf %223, %222 : vector<8x128xf32>
    %225 = arith.divf %223, %224 : vector<8x128xf32>
    %226 = math.tanh %220 : vector<8x128xf32>
    %227 = vector.extract_strided_slice %225 {offsets = [0, 0], sizes = [8, 32], strides = [1, 1]} : vector<8x128xf32> to vector<8x32xf32>
    %228 = vector.extract_strided_slice %225 {offsets = [0, 32], sizes = [8, 32], strides = [1, 1]} : vector<8x128xf32> to vector<8x32xf32>
    %229 = vector.extract_strided_slice %226 {offsets = [0, 64], sizes = [8, 32], strides = [1, 1]} : vector<8x128xf32> to vector<8x32xf32>
    %230 = vector.extract_strided_slice %225 {offsets = [0, 96], sizes = [8, 32], strides = [1, 1]} : vector<8x128xf32> to vector<8x32xf32>
    %231 = arith.mulf %228, %214 : vector<8x32xf32>
    %232 = arith.mulf %227, %229 : vector<8x32xf32>
    %233 = arith.addf %231, %232 : vector<8x32xf32>
    %234 = math.tanh %233 : vector<8x32xf32>
    %235 = arith.mulf %230, %234 : vector<8x32xf32>
    %236 = vector.extract_strided_slice %195 {offsets = [2, 0, 0], sizes = [1, 8, 128], strides = [1, 1, 1]} : vector<8x8x128xf32> to vector<1x8x128xf32>
    %237 = vector.shape_cast %236 : vector<1x8x128xf32> to vector<8x128xf32>
    %cst_59 = arith.constant dense<0.000000e+00> : vector<8x128xf32>
    %238 = tpu.matmul %235, %188, %cst_59 {dimension_numbers = #tpu.dot_dimension_numbers<[1], [0], [0], [1], [0, 0, 1, 1], [], []>} : vector<8x32xf32>, vector<32x128xf32>, vector<8x128xf32> -> vector<8x128xf32>
    %239 = arith.addf %237, %238 : vector<8x128xf32>
    %240 = arith.negf %239 : vector<8x128xf32>
    %241 = math.exp %240 : vector<8x128xf32>
    %cst_60 = arith.constant 1.000000e+00 : f32
    %242 = vector.broadcast %cst_60 : f32 to vector<8x128xf32>
    %243 = arith.addf %242, %241 : vector<8x128xf32>
    %244 = arith.divf %242, %243 : vector<8x128xf32>
    %245 = math.tanh %239 : vector<8x128xf32>
    %246 = vector.extract_strided_slice %244 {offsets = [0, 0], sizes = [8, 32], strides = [1, 1]} : vector<8x128xf32> to vector<8x32xf32>
    %247 = vector.extract_strided_slice %244 {offsets = [0, 32], sizes = [8, 32], strides = [1, 1]} : vector<8x128xf32> to vector<8x32xf32>
    %248 = vector.extract_strided_slice %245 {offsets = [0, 64], sizes = [8, 32], strides = [1, 1]} : vector<8x128xf32> to vector<8x32xf32>
    %249 = vector.extract_strided_slice %244 {offsets = [0, 96], sizes = [8, 32], strides = [1, 1]} : vector<8x128xf32> to vector<8x32xf32>
    %250 = arith.mulf %247, %233 : vector<8x32xf32>
    %251 = arith.mulf %246, %248 : vector<8x32xf32>
    %252 = arith.addf %250, %251 : vector<8x32xf32>
    %253 = math.tanh %252 : vector<8x32xf32>
    %254 = arith.mulf %249, %253 : vector<8x32xf32>
    %255 = vector.extract_strided_slice %195 {offsets = [3, 0, 0], sizes = [1, 8, 128], strides = [1, 1, 1]} : vector<8x8x128xf32> to vector<1x8x128xf32>
    %256 = vector.shape_cast %255 : vector<1x8x128xf32> to vector<8x128xf32>
    %cst_61 = arith.constant dense<0.000000e+00> : vector<8x128xf32>
    %257 = tpu.matmul %254, %188, %cst_61 {dimension_numbers = #tpu.dot_dimension_numbers<[1], [0], [0], [1], [0, 0, 1, 1], [], []>} : vector<8x32xf32>, vector<32x128xf32>, vector<8x128xf32> -> vector<8x128xf32>
    %258 = arith.addf %256, %257 : vector<8x128xf32>
    %259 = arith.negf %258 : vector<8x128xf32>
    %260 = math.exp %259 : vector<8x128xf32>
    %cst_62 = arith.constant 1.000000e+00 : f32
    %261 = vector.broadcast %cst_62 : f32 to vector<8x128xf32>
    %262 = arith.addf %261, %260 : vector<8x128xf32>
    %263 = arith.divf %261, %262 : vector<8x128xf32>
    %264 = math.tanh %258 : vector<8x128xf32>
    %265 = vector.extract_strided_slice %263 {offsets = [0, 0], sizes = [8, 32], strides = [1, 1]} : vector<8x128xf32> to vector<8x32xf32>
    %266 = vector.extract_strided_slice %263 {offsets = [0, 32], sizes = [8, 32], strides = [1, 1]} : vector<8x128xf32> to vector<8x32xf32>
    %267 = vector.extract_strided_slice %264 {offsets = [0, 64], sizes = [8, 32], strides = [1, 1]} : vector<8x128xf32> to vector<8x32xf32>
    %268 = vector.extract_strided_slice %263 {offsets = [0, 96], sizes = [8, 32], strides = [1, 1]} : vector<8x128xf32> to vector<8x32xf32>
    %269 = arith.mulf %266, %252 : vector<8x32xf32>
    %270 = arith.mulf %265, %267 : vector<8x32xf32>
    %271 = arith.addf %269, %270 : vector<8x32xf32>
    %272 = math.tanh %271 : vector<8x32xf32>
    %273 = arith.mulf %268, %272 : vector<8x32xf32>
    %274 = vector.extract_strided_slice %195 {offsets = [4, 0, 0], sizes = [1, 8, 128], strides = [1, 1, 1]} : vector<8x8x128xf32> to vector<1x8x128xf32>
    %275 = vector.shape_cast %274 : vector<1x8x128xf32> to vector<8x128xf32>
    %cst_63 = arith.constant dense<0.000000e+00> : vector<8x128xf32>
    %276 = tpu.matmul %273, %188, %cst_63 {dimension_numbers = #tpu.dot_dimension_numbers<[1], [0], [0], [1], [0, 0, 1, 1], [], []>} : vector<8x32xf32>, vector<32x128xf32>, vector<8x128xf32> -> vector<8x128xf32>
    %277 = arith.addf %275, %276 : vector<8x128xf32>
    %278 = arith.negf %277 : vector<8x128xf32>
    %279 = math.exp %278 : vector<8x128xf32>
    %cst_64 = arith.constant 1.000000e+00 : f32
    %280 = vector.broadcast %cst_64 : f32 to vector<8x128xf32>
    %281 = arith.addf %280, %279 : vector<8x128xf32>
    %282 = arith.divf %280, %281 : vector<8x128xf32>
    %283 = math.tanh %277 : vector<8x128xf32>
    %284 = vector.extract_strided_slice %282 {offsets = [0, 0], sizes = [8, 32], strides = [1, 1]} : vector<8x128xf32> to vector<8x32xf32>
    %285 = vector.extract_strided_slice %282 {offsets = [0, 32], sizes = [8, 32], strides = [1, 1]} : vector<8x128xf32> to vector<8x32xf32>
    %286 = vector.extract_strided_slice %283 {offsets = [0, 64], sizes = [8, 32], strides = [1, 1]} : vector<8x128xf32> to vector<8x32xf32>
    %287 = vector.extract_strided_slice %282 {offsets = [0, 96], sizes = [8, 32], strides = [1, 1]} : vector<8x128xf32> to vector<8x32xf32>
    %288 = arith.mulf %285, %271 : vector<8x32xf32>
    %289 = arith.mulf %284, %286 : vector<8x32xf32>
    %290 = arith.addf %288, %289 : vector<8x32xf32>
    %291 = math.tanh %290 : vector<8x32xf32>
    %292 = arith.mulf %287, %291 : vector<8x32xf32>
    %293 = vector.extract_strided_slice %195 {offsets = [5, 0, 0], sizes = [1, 8, 128], strides = [1, 1, 1]} : vector<8x8x128xf32> to vector<1x8x128xf32>
    %294 = vector.shape_cast %293 : vector<1x8x128xf32> to vector<8x128xf32>
    %cst_65 = arith.constant dense<0.000000e+00> : vector<8x128xf32>
    %295 = tpu.matmul %292, %188, %cst_65 {dimension_numbers = #tpu.dot_dimension_numbers<[1], [0], [0], [1], [0, 0, 1, 1], [], []>} : vector<8x32xf32>, vector<32x128xf32>, vector<8x128xf32> -> vector<8x128xf32>
    %296 = arith.addf %294, %295 : vector<8x128xf32>
    %297 = arith.negf %296 : vector<8x128xf32>
    %298 = math.exp %297 : vector<8x128xf32>
    %cst_66 = arith.constant 1.000000e+00 : f32
    %299 = vector.broadcast %cst_66 : f32 to vector<8x128xf32>
    %300 = arith.addf %299, %298 : vector<8x128xf32>
    %301 = arith.divf %299, %300 : vector<8x128xf32>
    %302 = math.tanh %296 : vector<8x128xf32>
    %303 = vector.extract_strided_slice %301 {offsets = [0, 0], sizes = [8, 32], strides = [1, 1]} : vector<8x128xf32> to vector<8x32xf32>
    %304 = vector.extract_strided_slice %301 {offsets = [0, 32], sizes = [8, 32], strides = [1, 1]} : vector<8x128xf32> to vector<8x32xf32>
    %305 = vector.extract_strided_slice %302 {offsets = [0, 64], sizes = [8, 32], strides = [1, 1]} : vector<8x128xf32> to vector<8x32xf32>
    %306 = vector.extract_strided_slice %301 {offsets = [0, 96], sizes = [8, 32], strides = [1, 1]} : vector<8x128xf32> to vector<8x32xf32>
    %307 = arith.mulf %304, %290 : vector<8x32xf32>
    %308 = arith.mulf %303, %305 : vector<8x32xf32>
    %309 = arith.addf %307, %308 : vector<8x32xf32>
    %310 = math.tanh %309 : vector<8x32xf32>
    %311 = arith.mulf %306, %310 : vector<8x32xf32>
    %312 = vector.extract_strided_slice %195 {offsets = [6, 0, 0], sizes = [1, 8, 128], strides = [1, 1, 1]} : vector<8x8x128xf32> to vector<1x8x128xf32>
    %313 = vector.shape_cast %312 : vector<1x8x128xf32> to vector<8x128xf32>
    %cst_67 = arith.constant dense<0.000000e+00> : vector<8x128xf32>
    %314 = tpu.matmul %311, %188, %cst_67 {dimension_numbers = #tpu.dot_dimension_numbers<[1], [0], [0], [1], [0, 0, 1, 1], [], []>} : vector<8x32xf32>, vector<32x128xf32>, vector<8x128xf32> -> vector<8x128xf32>
    %315 = arith.addf %313, %314 : vector<8x128xf32>
    %316 = arith.negf %315 : vector<8x128xf32>
    %317 = math.exp %316 : vector<8x128xf32>
    %cst_68 = arith.constant 1.000000e+00 : f32
    %318 = vector.broadcast %cst_68 : f32 to vector<8x128xf32>
    %319 = arith.addf %318, %317 : vector<8x128xf32>
    %320 = arith.divf %318, %319 : vector<8x128xf32>
    %321 = math.tanh %315 : vector<8x128xf32>
    %322 = vector.extract_strided_slice %320 {offsets = [0, 0], sizes = [8, 32], strides = [1, 1]} : vector<8x128xf32> to vector<8x32xf32>
    %323 = vector.extract_strided_slice %320 {offsets = [0, 32], sizes = [8, 32], strides = [1, 1]} : vector<8x128xf32> to vector<8x32xf32>
    %324 = vector.extract_strided_slice %321 {offsets = [0, 64], sizes = [8, 32], strides = [1, 1]} : vector<8x128xf32> to vector<8x32xf32>
    %325 = vector.extract_strided_slice %320 {offsets = [0, 96], sizes = [8, 32], strides = [1, 1]} : vector<8x128xf32> to vector<8x32xf32>
    %326 = arith.mulf %323, %309 : vector<8x32xf32>
    %327 = arith.mulf %322, %324 : vector<8x32xf32>
    %328 = arith.addf %326, %327 : vector<8x32xf32>
    %329 = math.tanh %328 : vector<8x32xf32>
    %330 = arith.mulf %325, %329 : vector<8x32xf32>
    %331 = vector.extract_strided_slice %195 {offsets = [7, 0, 0], sizes = [1, 8, 128], strides = [1, 1, 1]} : vector<8x8x128xf32> to vector<1x8x128xf32>
    %332 = vector.shape_cast %331 : vector<1x8x128xf32> to vector<8x128xf32>
    %cst_69 = arith.constant dense<0.000000e+00> : vector<8x128xf32>
    %333 = tpu.matmul %330, %188, %cst_69 {dimension_numbers = #tpu.dot_dimension_numbers<[1], [0], [0], [1], [0, 0, 1, 1], [], []>} : vector<8x32xf32>, vector<32x128xf32>, vector<8x128xf32> -> vector<8x128xf32>
    %334 = arith.addf %332, %333 : vector<8x128xf32>
    %335 = arith.negf %334 : vector<8x128xf32>
    %336 = math.exp %335 : vector<8x128xf32>
    %cst_70 = arith.constant 1.000000e+00 : f32
    %337 = vector.broadcast %cst_70 : f32 to vector<8x128xf32>
    %338 = arith.addf %337, %336 : vector<8x128xf32>
    %339 = arith.divf %337, %338 : vector<8x128xf32>
    %340 = math.tanh %334 : vector<8x128xf32>
    %341 = vector.extract_strided_slice %339 {offsets = [0, 0], sizes = [8, 32], strides = [1, 1]} : vector<8x128xf32> to vector<8x32xf32>
    %342 = vector.extract_strided_slice %339 {offsets = [0, 32], sizes = [8, 32], strides = [1, 1]} : vector<8x128xf32> to vector<8x32xf32>
    %343 = vector.extract_strided_slice %340 {offsets = [0, 64], sizes = [8, 32], strides = [1, 1]} : vector<8x128xf32> to vector<8x32xf32>
    %344 = vector.extract_strided_slice %339 {offsets = [0, 96], sizes = [8, 32], strides = [1, 1]} : vector<8x128xf32> to vector<8x32xf32>
    %345 = arith.mulf %342, %328 : vector<8x32xf32>
    %346 = arith.mulf %341, %343 : vector<8x32xf32>
    %347 = arith.addf %345, %346 : vector<8x32xf32>
    %348 = math.tanh %347 : vector<8x32xf32>
    %349 = arith.mulf %344, %348 : vector<8x32xf32>
    %c0_71 = arith.constant 0 : index
    %c0_72 = arith.constant 0 : index
    %350 = vector.load %arg7[%c0_71, %c0_72] : memref<1x32xf32, #tpu.memory_space<vmem>>, vector<1x32xf32>
    %351 = vector.broadcast %350 : vector<1x32xf32> to vector<8x32xf32>
    %352 = arith.mulf %349, %351 : vector<8x32xf32>
    %cst_73 = arith.constant dense<0.000000e+00> : vector<8xf32>
    %353 = vector.multi_reduction <add>, %352, %cst_73 [1] : vector<8x32xf32> to vector<8xf32>
    %354 = vector.shape_cast %353 : vector<8xf32> to vector<8x1xf32>
    %c0_74 = arith.constant 0 : index
    %c0_75 = arith.constant 0 : index
    %355 = vector.load %arg8[%c0_74, %c0_75] : memref<1x1xf32, #tpu.memory_space<vmem>>, vector<1x1xf32>
    %356 = vector.broadcast %355 : vector<1x1xf32> to vector<8x1xf32>
    %357 = arith.addf %354, %356 : vector<8x1xf32>
    %c0_76 = arith.constant 0 : index
    %c0_77 = arith.constant 0 : index
    %358 = vector.load %arg9[%c0_76, %c0_77] : memref<8x1xf32, #tpu.memory_space<vmem>>, vector<8x1xf32>
    tpu.vector_store %arg9[%c0_76, %c0_77], %357 {strides = array<i32>} : memref<8x1xf32, #tpu.memory_space<vmem>>, vector<8x1xf32>,
    return
  }
}

</mosaic_0001>

<bundles_post_ra>
// kernel: tpu_custom_call.1
= control target key start
LH: loop header
LB: loop body
LE: loop exit
PB: predicated region body
PF: predicated region fallthrough
CT: control target
= control target key end

     0   :  { %s3039_s0 = inlined_call_operand.vmem [shape: f32[8,8,3], index: 0, kind: input, shape index: {}]   ;;  %s3040_s1 = inlined_call_operand.hbm [shape: f32[3,128], index: 1, kind: input, shape index: {}]   ;;  %s3041_s2 = inlined_call_operand.vmem [shape: f32[32,128], index: 2, kind: input, shape index: {}]   ;;  %s3042_s3 = inlined_call_operand.vmem [shape: f32[1,128], index: 3, kind: input, shape index: {}]   ;;  %s3043_s4 = inlined_call_operand.vmem [shape: f32[32,128], index: 4, kind: input, shape index: {}]   ;;  %s3044_s5 = inlined_call_operand.vmem [shape: f32[32,128], index: 5, kind: input, shape index: {}]   ;;  %s3045_s6 = inlined_call_operand.vmem [shape: f32[1,128], index: 6, kind: input, shape index: {}]   ;;  %s3046_s7 = inlined_call_operand.vmem [shape: f32[1,32], index: 7, kind: input, shape index: {}]   ;;  %s3047_s8 = inlined_call_operand.<no memory space> [shape: f32[1,1], index: 8, kind: input, shape index: {}]   ;;  %s3048_s9 = inlined_call_operand.vmem [shape: f32[8,1], index: 9, kind: output, shape index: {}]  }
   0x1   :  { %v14_v0 = vstv %s3047_s8 }
   0x2   :  { %15 = vst [vmem:[#allocation3] sm:$0x1] %v14_v0 }
   0x3   :  { %16 = vsyncpa [#allocation5], 0  ;;  %s2629_s11 = smov [#allocation4]   ;;  %s2605_s15 = scalar_lea.hbm %s3040_s1, 64 }
   0x4   :  { %s25_s12 = sshll.u32 %s2629_s11, 4  ;;  %p2606_p0 = scmp.ne.s32.totalorder %s3040_s1, %s2605_s15  ;;  %s26_s12 = int_to_ptr.vmem [resolvable:$true] %s25_s12 }
   0x5   :  { %p2609_p1 = scmp.lt.u32.totalorder %s2605_s15, %s3040_s1 }
   0x7   :  { %p2611_p2 = pnand %p2609_p1, %p2606_p0 }
   0x9   :  { %2614 = shalt.err (!%p2611_p2)
}
   0xa   :  { %s2615_s8 = scalar_lea.vmem %s26_s12, 64  ;;  %p2620_p4 = scmp.lt.s32.totalorder %s26_s12, %s26_s12 }
   0xb   :  { %p2616_p3 = scmp.ne.s32.totalorder %s26_s12, %s2615_s8  ;;  %p2621_p5 = scmp.lt.s32.totalorder %s2615_s8, %s2615_s8 }
   0xd   :  { %p2622_p6 = por %p2621_p5, %p2620_p4 }
   0xf   :  { %p2623_p7 = pnand %p2622_p6, %p2616_p3 }
  0x11   :  { %2626 = shalt.err (!%p2623_p7)
}
  0x12   :  { %28 = dma.hbm_to_vmem [thread:$0]  %s3040_s1, 64, %s26_s12, [#allocation5]  }
  0x13   :  { %2627 = dma.done.wait [#allocation5], 64  }
  0x14   :  { %2628 = vsyncadd [#allocation5], 4294967232  ;;  %v2630_v1 = vmov 0.0|0.0   ;;  %vm2631_vm0 = vmmov 0   ;;  %v2632_v2 = vmov 0.0   ;;  %vm91_vm1 = vcmask 1042432  }
  0x15   :  { %2366 = vmatprep.subr.bf16.mxu1 %v2630_v1  ;;  %2178 = vmatprep.mubr.msk.f32.mxu1 %vm2631_vm0, %v2632_v2  ;;  %vm66_vm2 = vcmask 23552   ;;  %v47_v3 = vld [vmem:[%s3041_s2] sm:$0xff]  ;;  %v48_v4 = vld [vmem:[%s3041_s2 + $0x8] sm:$0xff]  ;;  %v49_v9 = vld [vmem:[%s3041_s2 + $0x10] sm:$0xff]  ;;  %s2633_s13 = smov 64   ;;  %vm200_vm3 = vcmask 261120  }
  0x16   :  { %v46_v5 = vld [vmem:[#allocation4] sm:$0x7]  ;;  %v2710_v6 = vpack.c.bf16 %v48_v4, %v47_v3  ;;  %v53_v8 = vld [vmem:[%s3039_s0 + $0x8] sm:$0xff]  ;;  %v50_v10 = vld [vmem:[%s3041_s2 + $0x18] sm:$0xff]  ;;  %s2635_s19 = smov 96   ;;  %vm1997_vm4 = vcmask 7168  }
  0x17   :  { %2156 = vmatprep.subr.msk.mxu0 %vm91_vm1, %v46_v5  ;;  %v52_v7 = vld [vmem:[%s3039_s0] sm:$0xff]  ;;  %v2727_v11 = vpack.c.bf16 %v50_v10, %v49_v9  ;;  %v54_v47 = vld [vmem:[%s3039_s0 + $0x10] sm:$0xff]  ;;  %v55_v48 = vld [vmem:[%s3039_s0 + $0x18] sm:$0xff] }
  0x18   :  { %2157 = vmatpush3.msk.msra.mxu0 %vm91_vm1, %v46_v5  ;;  %2158 = vmatprep.mubr.msk.f32.mxu0 %vm66_vm2, %v52_v7  ;;  %v2747_v13 = vld [vmem:[%s3042_s3] ss:$0 sm:$0xff]  ;;  %s2634_s3 = smov 32   ;;  %v57_v50 = vld [vmem:[%s3039_s0 + $0x28] sm:$0xff]  ;;  %v58_v51 = vld [vmem:[%s3039_s0 + $0x30] sm:$0xff] }
  0x19   :  { %2368 = vmatpush3.bf16.msra.mxu1 %v2710_v6  ;;  %2159 = vmatmul.mubr.msk.f32.vlgmr.msra.gmra.mrb[0].mxu0 %vm66_vm2, %v53_v8  ;;  %v56_v49 = vld [vmem:[%s3039_s0 + $0x20] sm:$0xff]  ;;  %v59_v52 = vld [vmem:[%s3039_s0 + $0x38] sm:$0xff] }
  0x1a   :  { %2369 = vmatprep.subr.bf16.mxu1 %v2630_v1  ;;  %2378 = vmatprep.subr.bf16.mxu0 %v2630_v1 }
  0x1b   :  { %2380 = vmatpush3.bf16.msra.mxu0 %v2710_v6  ;;  %2161 = vmatprep.mubr.msk.f32.mxu0 %vm66_vm2, %v54_v47 }
  0x1c   :  { %2381 = vmatprep.subr.bf16.mxu0 %v2630_v1 }
  0x1d   :  { %2371 = vmatpush3.bf16.msra.mxu1 %v2727_v11  ;;  %2162 = vmatmul.mubr.msk.f32.gmra.mrb[2].mxu0 %vm66_vm2, %v55_v48 }
  0x1e   :  { %2372 = vmatprep.subr.bf16.mxu1 %v2630_v1  ;;  %2164 = vmatprep.mubr.msk.f32.mxu0 %vm66_vm2, %v56_v49 }
  0x1f   :  { %2383 = vmatpush3.bf16.msra.mxu0 %v2727_v11 }
  0x20   :  { %2179 = vmatmul.mubr.f32.vlgmr.msra.gmra.mrb[0].mxu1 %v2632_v2  ;;  %2390 = vmatprep.subr.bf16.mxu0 %v2630_v1 }
  0x21   :  { %2374 = vmatpush3.bf16.msra.mxu1 %v2710_v6  ;;  %2189 = vmatprep.mubr.msk.f32.mxu1 %vm2631_vm0, %v2632_v2 }
  0x22   :  { %2375 = vmatprep.subr.bf16.mxu1 %v2630_v1  ;;  %2165 = vmatmul.mubr.msk.f32.gmra.mrb[4].mxu0 %vm66_vm2, %v57_v50 }
  0x23   :  { %2167 = vmatprep.mubr.msk.f32.mxu0 %vm66_vm2, %v58_v51 }
  0x25   :  { %2377 = vmatpush3.bf16.msra.mxu1 %v2727_v11 }
  0x26   :  { %2384 = vmatprep.subr.bf16.mxu1 %v2630_v1  ;;  %2168 = vmatmul.mubr.msk.f32.gmra.mrb[6].mxu0 %vm66_vm2, %v59_v52 }
  0x27   :  { %2200 = vmatprep.mubr.msk.f32.mxu0 %vm2631_vm0, %v2632_v2 }
  0xec   :  { %v2160_v12 = vpop.f32.mrb[0].mxu0 }
  0xed   :  { %v161_v14 = vpop.f32.mrb[1].mxu0  ;;  %v167_v33 = vadd.f32 %v2160_v12, %v2747_v13 }
  0xee   :  { %v162_v15 = vadd.f32 %v2747_v13, %v161_v14 }
  0xf0   :  { %v2163_v56 = vpop.f32.mrb[2].mxu0 }
  0xf1   :  { %v171_v57 = vpop.f32.mrb[3].mxu0 }
  0xf2   :  { %v172_v63 = vadd.f32 %v2747_v13, %v171_v57 }
  0xf3   :  { %v270_v16 = vpop.f32.mrb[0].mxu1 }
  0xf4   :  { %v274_v17 = vadd.f32 %v270_v16, %v162_v15  ;;  %v2180_v18 = vpop.f32.mrb[1].mxu1 }
  0xf5   :  { %v2793_v58 = vpop.f32.mrb[4].mxu0 }
  0xf6   :  { %2477 = vtanh.f32 %v274_v17  ;;  %v2014_v20 = vmul.f32 -1.442695, %v274_v17  ;;  %v2795_v59 = vpop.f32.mrb[5].mxu0 }
  0xf8   :  { %2479 = vpow2.f32 %v2014_v20 }
  0xf9   :  { %v2797_v60 = vpop.f32.mrb[6].mxu0 }
  0xfa   :  { %v2799_v61 = vpop.f32.mrb[7].mxu0 }
 0x100   :  { %v2478_v19 = vpop.eup %2477 }
 0x101   :  { %284 = vrot.lane.b32.xlu0 %v2478_v19, %s2633_s13 }
 0x102   :  { %v2480_v21 = vpop.eup %2479 }
 0x103   :  { %v278_v22 = vadd.f32 1.0, %v2480_v21 }
 0x105   :  { %2481 = vrcp.f32 %v278_v22  ;;  %v177_v22 = vadd.f32 %v2163_v56, %v2747_v13 }
 0x10f   :  { %v2482_v23 = vpop.eup %2481 }
 0x110   :  { %v282_v26 = vmul.f32 0.0, %v2482_v23 }
 0x173   :  { %v285_v24 = vpop.permute.xlu0 %284 }
 0x174   :  { %v287_v25 = vmul.f32 %v2482_v23, %v285_v24 }
 0x176   :  { %289 = vrot.lane.b32.xlu0 %v287_v25, %s2634_s3 }
 0x1e8   :  { %v290_v27 = vpop.permute.xlu0 %289 }
 0x1e9   :  { %v292_v28 = vadd.f32 %v290_v27, %v282_v26 }
 0x1eb   :  { %2483 = vtanh.f32 %v292_v28 }
 0x1f5   :  { %v2484_v29 = vpop.eup %2483 }
 0x1f6   :  { %295 = vrot.lane.b32.xlu1 %v2484_v29, %s2633_s13 }
 0x268   :  { %v296_v30 = vpop.permute.xlu1 %295 }
 0x269   :  { %v298_v31 = vmul.f32 %v2482_v23, %v296_v30 }
 0x26b   :  { %300 = vrot.lane.b32.xlu1 %v298_v31, %s2634_s3 }
 0x2dd   :  { %v301_v32 = vpop.permute.xlu1 %300 }
 0x2de   :  { %303 = vst.msk [vmem:[#allocation2] sm:$0xff] %vm200_vm3, %v301_v32  ;;  %2190 = vmatmul.mubr.msk.f32.vlgmr.msra.gmra.mrb[2].mxu1 %vm200_vm3, %v301_v32 }
 0x2df   :  { %2386 = vmatpush3.bf16.msra.mxu1 %v2710_v6  ;;  %2211 = vmatprep.mubr.msk.f32.mxu1 %vm2631_vm0, %v2632_v2 }
 0x2e0   :  { %2387 = vmatprep.subr.bf16.mxu1 %v2630_v1 }
 0x2e3   :  { %2389 = vmatpush3.bf16.msra.mxu1 %v2727_v11 }
 0x2e4   :  { %2396 = vmatprep.subr.bf16.mxu1 %v2630_v1 }
 0x3b1   :  { %v372_v34 = vpop.f32.mrb[2].mxu1 }
 0x3b2   :  { %v376_v35 = vadd.f32 %v372_v34, %v167_v33  ;;  %v2191_v36 = vpop.f32.mrb[3].mxu1 }
 0x3b4   :  { %2485 = vtanh.f32 %v376_v35  ;;  %v2016_v38 = vmul.f32 -1.442695, %v376_v35 }
 0x3b6   :  { %2487 = vpow2.f32 %v2016_v38 }
 0x3be   :  { %v2486_v37 = vpop.eup %2485 }
 0x3bf   :  { %386 = vrot.lane.b32.xlu0 %v2486_v37, %s2633_s13 }
 0x3c0   :  { %v2488_v39 = vpop.eup %2487 }
 0x3c1   :  { %v380_v40 = vadd.f32 1.0, %v2488_v39 }
 0x3c3   :  { %2489 = vrcp.f32 %v380_v40  ;;  %v182_v40 = vadd.f32 %v2747_v13, %v2795_v59  ;;  %v187_v59 = vadd.f32 %v2793_v58, %v2747_v13 }
 0x3cd   :  { %v2490_v41 = vpop.eup %2489 }
 0x3ce   :  { %v384_v44 = vmul.f32 %v2490_v41, %v292_v28 }
 0x431   :  { %v387_v42 = vpop.permute.xlu0 %386 }
 0x432   :  { %v389_v43 = vmul.f32 %v2490_v41, %v387_v42 }
 0x434   :  { %391 = vrot.lane.b32.xlu1 %v389_v43, %s2634_s3 }
 0x4a6   :  { %v392_v45 = vpop.permute.xlu1 %391 }
 0x4a7   :  { %v394_v46 = vadd.f32 %v392_v45, %v384_v44 }
 0x4a9   :  { %2491 = vtanh.f32 %v394_v46 }
 0x4b3   :  { %v2492_v53 = vpop.eup %2491 }
 0x4b4   :  { %397 = vrot.lane.b32.xlu0 %v2492_v53, %s2633_s13 }
 0x526   :  { %v398_v54 = vpop.permute.xlu0 %397 }
 0x527   :  { %v400_v55 = vmul.f32 %v2490_v41, %v398_v54 }
 0x529   :  { %402 = vrot.lane.b32.xlu1 %v400_v55, %s2634_s3 }
 0x59b   :  { %v403_v62 = vpop.permute.xlu1 %402 }
 0x59c   :  { %406 = vst.msk [vmem:[#allocation2 + $0x8] sm:$0xff] %vm200_vm3, %v403_v62  ;;  %2201 = vmatmul.mubr.msk.f32.vlgmr.msra.gmra.mrb[8].mxu0 %vm200_vm3, %v403_v62 }
 0x59d   :  { %2392 = vmatpush3.bf16.msra.mxu0 %v2710_v6  ;;  %2222 = vmatprep.mubr.msk.f32.mxu0 %vm2631_vm0, %v2632_v2 }
 0x59e   :  { %2393 = vmatprep.subr.bf16.mxu0 %v2630_v1 }
 0x5a1   :  { %2395 = vmatpush3.bf16.msra.mxu0 %v2727_v11 }
 0x5a2   :  { %2402 = vmatprep.subr.bf16.mxu0 %v2630_v1 }
 0x66f   :  { %v475_v0 = vpop.f32.mrb[8].mxu0 }
 0x670   :  { %v479_v3 = vadd.f32 %v475_v0, %v172_v63  ;;  %v2202_v4 = vpop.f32.mrb[9].mxu0 }
 0x672   :  { %2493 = vtanh.f32 %v479_v3  ;;  %v2018_v7 = vmul.f32 -1.442695, %v479_v3 }
 0x674   :  { %2495 = vpow2.f32 %v2018_v7 }
 0x67c   :  { %v2494_v5 = vpop.eup %2493 }
 0x67d   :  { %489 = vrot.lane.b32.xlu0 %v2494_v5, %s2633_s13 }
 0x67e   :  { %v2496_v8 = vpop.eup %2495 }
 0x67f   :  { %v483_v9 = vadd.f32 1.0, %v2496_v8 }
 0x681   :  { %2497 = vrcp.f32 %v483_v9 }
 0x68b   :  { %v2498_v10 = vpop.eup %2497 }
 0x68c   :  { %v487_v15 = vmul.f32 %v2498_v10, %v394_v46 }
 0x6ef   :  { %v490_v12 = vpop.permute.xlu0 %489 }
 0x6f0   :  { %v492_v14 = vmul.f32 %v2498_v10, %v490_v12  ;;  %v1025_v12 = vld [vmem:[%s3043_s4] sm:$0xff] }
 0x6f2   :  { %494 = vrot.lane.b32.xlu1 %v492_v14, %s2634_s3  ;;  %v1026_v14 = vld [vmem:[%s3043_s4 + $0x8] sm:$0xff] }
 0x764   :  { %v495_v16 = vpop.permute.xlu1 %494 }
 0x765   :  { %v497_v17 = vadd.f32 %v495_v16, %v487_v15  ;;  %v2414_v15 = vpack.c.bf16 %v1026_v14, %v1025_v12 }
 0x767   :  { %2499 = vtanh.f32 %v497_v17 }
 0x771   :  { %v2500_v18 = vpop.eup %2499 }
 0x772   :  { %500 = vrot.lane.b32.xlu0 %v2500_v18, %s2633_s13 }
 0x7e4   :  { %v501_v19 = vpop.permute.xlu0 %500 }
 0x7e5   :  { %v503_v20 = vmul.f32 %v2498_v10, %v501_v19  ;;  %v1027_v19 = vld [vmem:[%s3043_s4 + $0x10] sm:$0xff] }
 0x7e7   :  { %505 = vrot.lane.b32.xlu1 %v503_v20, %s2634_s3  ;;  %v1028_v20 = vld [vmem:[%s3043_s4 + $0x18] sm:$0xff] }
 0x859   :  { %v506_v21 = vpop.permute.xlu1 %505 }
 0x85a   :  { %509 = vst.msk [vmem:[#allocation2 + $0x10] sm:$0xff] %vm200_vm3, %v506_v21  ;;  %2212 = vmatmul.mubr.msk.f32.vlgmr.msra.gmra.mrb[4].mxu1 %vm200_vm3, %v506_v21  ;;  %v2418_v21 = vpack.c.bf16 %v1028_v20, %v1027_v19 }
 0x85b   :  { %2398 = vmatpush3.bf16.msra.mxu1 %v2710_v6  ;;  %2233 = vmatprep.mubr.msk.f32.mxu1 %vm2631_vm0, %v2632_v2 }
 0x85c   :  { %2399 = vmatprep.subr.bf16.mxu1 %v2630_v1 }
 0x85f   :  { %2401 = vmatpush3.bf16.msra.mxu1 %v2727_v11 }
 0x860   :  { %2408 = vmatprep.subr.bf16.mxu1 %v2630_v1 }
 0x92d   :  { %v578_v23 = vpop.f32.mrb[4].mxu1 }
 0x92e   :  { %v582_v24 = vadd.f32 %v578_v23, %v177_v22  ;;  %v2213_v25 = vpop.f32.mrb[5].mxu1  ;;  %v1034_v23 = vld [vmem:[#allocation2] sm:$0xff] }
 0x92f   :  { %v1036_v25 = vld [vmem:[#allocation2 + $0x10] sm:$0xff] }
 0x930   :  { %2501 = vtanh.f32 %v582_v24  ;;  %v2020_v27 = vmul.f32 -1.442695, %v582_v24  ;;  %v1035_v24 = vld [vmem:[#allocation2 + $0x8] sm:$0xff] }
 0x932   :  { %2503 = vpow2.f32 %v2020_v27 }
 0x93a   :  { %v2502_v26 = vpop.eup %2501 }
 0x93b   :  { %592 = vrot.lane.b32.xlu0 %v2502_v26, %s2633_s13 }
 0x93c   :  { %v2504_v28 = vpop.eup %2503 }
 0x93d   :  { %v586_v29 = vadd.f32 1.0, %v2504_v28 }
 0x93f   :  { %2505 = vrcp.f32 %v586_v29  ;;  %v192_v29 = vadd.f32 %v2747_v13, %v2799_v61 }
 0x949   :  { %v2506_v30 = vpop.eup %2505 }
 0x94a   :  { %v590_v33 = vmul.f32 %v2506_v30, %v497_v17 }
 0x9ad   :  { %v593_v31 = vpop.permute.xlu0 %592 }
 0x9ae   :  { %v595_v32 = vmul.f32 %v2506_v30, %v593_v31 }
 0x9b0   :  { %597 = vrot.lane.b32.xlu1 %v595_v32, %s2634_s3 }
 0xa22   :  { %v598_v34 = vpop.permute.xlu1 %597 }
 0xa23   :  { %v600_v35 = vadd.f32 %v598_v34, %v590_v33 }
 0xa25   :  { %2507 = vtanh.f32 %v600_v35 }
 0xa2f   :  { %v2508_v36 = vpop.eup %2507 }
 0xa30   :  { %603 = vrot.lane.b32.xlu0 %v2508_v36, %s2633_s13 }
 0xaa2   :  { %v604_v37 = vpop.permute.xlu0 %603 }
 0xaa3   :  { %v606_v38 = vmul.f32 %v2506_v30, %v604_v37 }
 0xaa5   :  { %608 = vrot.lane.b32.xlu1 %v606_v38, %s2634_s3 }
 0xb17   :  { %v609_v39 = vpop.permute.xlu1 %608 }
 0xb18   :  { %612 = vst.msk [vmem:[#allocation2 + $0x18] sm:$0xff] %vm200_vm3, %v609_v39  ;;  %2223 = vmatmul.mubr.msk.f32.vlgmr.msra.gmra.mrb[10].mxu0 %vm200_vm3, %v609_v39 }
 0xb19   :  { %2404 = vmatpush3.bf16.msra.mxu0 %v2710_v6  ;;  %2244 = vmatprep.mubr.msk.f32.mxu0 %vm2631_vm0, %v2632_v2 }
 0xb1a   :  { %2405 = vmatprep.subr.bf16.mxu0 %v2630_v1 }
 0xb1d   :  { %2407 = vmatpush3.bf16.msra.mxu0 %v2727_v11 }
 0xb1e   :  { %2415 = vmatprep.subr.bf16.mxu0 %v2414_v15 }
 0xb1f   :  { %v1037_v26 = vld [vmem:[#allocation2 + $0x18] sm:$0xff] }
 0xbeb   :  { %v681_v41 = vpop.f32.mrb[10].mxu0 }
 0xbec   :  { %v685_v42 = vadd.f32 %v681_v41, %v182_v40  ;;  %v2224_v43 = vpop.f32.mrb[11].mxu0 }
 0xbee   :  { %2509 = vtanh.f32 %v685_v42  ;;  %v2022_v45 = vmul.f32 -1.442695, %v685_v42 }
 0xbf0   :  { %2511 = vpow2.f32 %v2022_v45 }
 0xbf8   :  { %v2510_v44 = vpop.eup %2509 }
 0xbf9   :  { %695 = vrot.lane.b32.xlu0 %v2510_v44, %s2633_s13 }
 0xbfa   :  { %v2512_v46 = vpop.eup %2511 }
 0xbfb   :  { %v689_v47 = vadd.f32 1.0, %v2512_v46 }
 0xbfd   :  { %2513 = vrcp.f32 %v689_v47 }
 0xc07   :  { %v2514_v48 = vpop.eup %2513 }
 0xc08   :  { %v693_v51 = vmul.f32 %v2514_v48, %v600_v35 }
 0xc6b   :  { %v696_v49 = vpop.permute.xlu0 %695 }
 0xc6c   :  { %v698_v50 = vmul.f32 %v2514_v48, %v696_v49  ;;  %v1029_v49 = vld [vmem:[%s3044_s5] sm:$0xff] }
 0xc6e   :  { %700 = vrot.lane.b32.xlu1 %v698_v50, %s2634_s3  ;;  %v1030_v50 = vld [vmem:[%s3044_s5 + $0x8] sm:$0xff] }
 0xce0   :  { %v701_v52 = vpop.permute.xlu1 %700 }
 0xce1   :  { %v703_v53 = vadd.f32 %v701_v52, %v693_v51  ;;  %v2899_v51 = vpack.c.bf16 %v1030_v50, %v1029_v49  ;;  %v1031_v52 = vld [vmem:[%s3044_s5 + $0x10] sm:$0xff] }
 0xce3   :  { %2515 = vtanh.f32 %v703_v53 }
 0xced   :  { %v2516_v54 = vpop.eup %2515 }
 0xcee   :  { %706 = vrot.lane.b32.xlu0 %v2516_v54, %s2633_s13 }
 0xd60   :  { %v707_v55 = vpop.permute.xlu0 %706 }
 0xd61   :  { %v709_v56 = vmul.f32 %v2514_v48, %v707_v55 }
 0xd63   :  { %711 = vrot.lane.b32.xlu1 %v709_v56, %s2634_s3 }
 0xdd5   :  { %v712_v57 = vpop.permute.xlu1 %711 }
 0xdd6   :  { %715 = vst.msk [vmem:[#allocation2 + $0x20] sm:$0xff] %vm200_vm3, %v712_v57  ;;  %2234 = vmatmul.mubr.msk.f32.vlgmr.msra.gmra.mrb[6].mxu1 %vm200_vm3, %v712_v57 }
 0xdd7   :  { %2410 = vmatpush3.bf16.msra.mxu1 %v2710_v6  ;;  %2255 = vmatprep.mubr.msk.f32.mxu1 %vm2631_vm0, %v2632_v2 }
 0xdd8   :  { %2411 = vmatprep.subr.bf16.mxu1 %v2630_v1 }
 0xddb   :  { %2413 = vmatpush3.bf16.msra.mxu1 %v2727_v11 }
 0xddc   :  { %2422 = vmatprep.subr.bf16.mxu1 %v2630_v1 }
 0xddd   :  { %v1038_v27 = vld [vmem:[#allocation2 + $0x20] sm:$0xff] }
 0xea9   :  { %v784_v62 = vpop.f32.mrb[6].mxu1 }
 0xeaa   :  { %v788_v63 = vadd.f32 %v784_v62, %v187_v59  ;;  %v2235_v0 = vpop.f32.mrb[7].mxu1  ;;  %v197_v62 = vadd.f32 %v2797_v60, %v2747_v13 }
 0xeac   :  { %2517 = vtanh.f32 %v788_v63  ;;  %v2024_v6 = vmul.f32 -1.442695, %v788_v63 }
 0xeae   :  { %2519 = vpow2.f32 %v2024_v6  ;;  %v2935_v6 = vld [vmem:[%s3045_s6] ss:$0 sm:$0xff] }
 0xeb6   :  { %v2518_v3 = vpop.eup %2517 }
 0xeb7   :  { %798 = vrot.lane.b32.xlu0 %v2518_v3, %s2633_s13 }
 0xeb8   :  { %v2520_v4 = vpop.eup %2519 }
 0xeb9   :  { %v792_v5 = vadd.f32 1.0, %v2520_v4 }
 0xebb   :  { %2521 = vrcp.f32 %v792_v5 }
 0xec5   :  { %v2522_v7 = vpop.eup %2521 }
 0xec6   :  { %v796_v9 = vmul.f32 %v2522_v7, %v703_v53  ;;  %v1032_v53 = vld [vmem:[%s3044_s5 + $0x18] sm:$0xff] }
 0xec7   :  { %v2909_v54 = vpack.c.bf16 %v1032_v53, %v1031_v52 }
 0xf29   :  { %v799_v8 = vpop.permute.xlu0 %798 }
 0xf2a   :  { %v801_v11 = vmul.f32 %v2522_v7, %v799_v8 }
 0xf2c   :  { %803 = vrot.lane.b32.xlu1 %v801_v11, %s2634_s3 }
 0xf9e   :  { %v804_v10 = vpop.permute.xlu1 %803 }
 0xf9f   :  { %v806_v58 = vadd.f32 %v804_v10, %v796_v9 }
 0xfa1   :  { %2523 = vtanh.f32 %v806_v58 }
 0xfab   :  { %v2524_v16 = vpop.eup %2523 }
 0xfac   :  { %809 = vrot.lane.b32.xlu0 %v2524_v16, %s2633_s13 }
0x101e   :  { %v810_v17 = vpop.permute.xlu0 %809 }
0x101f   :  { %v812_v18 = vmul.f32 %v2522_v7, %v810_v17 }
0x1021   :  { %814 = vrot.lane.b32.xlu1 %v812_v18, %s2634_s3 }
0x1093   :  { %v815_v22 = vpop.permute.xlu1 %814 }
0x1094   :  { %818 = vst.msk [vmem:[#allocation2 + $0x28] sm:$0xff] %vm200_vm3, %v815_v22  ;;  %2245 = vmatmul.mubr.msk.f32.vlgmr.msra.gmra.mrb[12].mxu0 %vm200_vm3, %v815_v22 }
0x1095   :  { %2417 = vmatpush3.bf16.msra.mxu0 %v2414_v15  ;;  %2266 = vmatprep.mubr.msk.f32.mxu0 %vm200_vm3, %v1034_v23 }
0x1096   :  { %2419 = vmatprep.subr.bf16.mxu0 %v2418_v21 }
0x1099   :  { %2421 = vmatpush3.bf16.msra.mxu0 %v2418_v21 }
0x109a   :  { %2434 = vmatprep.subr.bf16.mxu0 %v2630_v1 }
0x109b   :  { %v1039_v28 = vld [vmem:[#allocation2 + $0x28] sm:$0xff] }
0x109c   :  { %2267 = vmatmul.mubr.msk.f32.vlgmr.msra.gmra.mrb[14].mxu0 %vm200_vm3, %v1035_v24 }
0x109d   :  { %2269 = vmatprep.mubr.msk.f32.mxu0 %vm200_vm3, %v1036_v25  ;;  %2436 = vmatpush3.bf16.msra.mxu0 %v2899_v51 }
0x109e   :  { %2437 = vmatprep.subr.bf16.mxu0 %v2630_v1 }
0x10a0   :  { %2270 = vmatmul.mubr.msk.f32.gmra.mrb[16].mxu0 %vm200_vm3, %v1037_v26 }
0x10a1   :  { %2272 = vmatprep.mubr.msk.f32.mxu0 %vm200_vm3, %v1038_v27  ;;  %2439 = vmatpush3.bf16.msra.mxu0 %v2909_v54 }
0x10a2   :  { %2446 = vmatprep.subr.bf16.mxu0 %v2630_v1 }
0x10a4   :  { %2273 = vmatmul.mubr.msk.f32.gmra.mrb[18].mxu0 %vm200_vm3, %v1039_v28 }
0x1167   :  { %v887_v30 = vpop.f32.mrb[12].mxu0 }
0x1168   :  { %v891_v31 = vadd.f32 %v887_v30, %v192_v29  ;;  %v2246_v32 = vpop.f32.mrb[13].mxu0 }
0x116a   :  { %2525 = vtanh.f32 %v891_v31  ;;  %v2026_v40 = vmul.f32 -1.442695, %v891_v31 }
0x116c   :  { %2527 = vpow2.f32 %v2026_v40 }
0x116f   :  { %v2877_v33 = vpop.f32.mrb[14].mxu0 }
0x1170   :  { %v1138_v34 = vpop.f32.mrb[15].mxu0 }
0x1171   :  { %v1139_v4 = vadd.f32 %v2935_v6, %v1138_v34 }
0x1173   :  { %v2879_v35 = vpop.f32.mrb[16].mxu0 }
0x1174   :  { %v2526_v36 = vpop.eup %2525  ;;  %v2881_v37 = vpop.f32.mrb[17].mxu0 }
0x1175   :  { %901 = vrot.lane.b32.xlu0 %v2526_v36, %s2633_s13  ;;  %v1144_v36 = vadd.f32 %v2877_v33, %v2935_v6 }
0x1176   :  { %v2528_v61 = vpop.eup %2527 }
0x1177   :  { %v2884_v38 = vpop.f32.mrb[18].mxu0  ;;  %v895_v41 = vadd.f32 1.0, %v2528_v61 }
0x1178   :  { %v2886_v39 = vpop.f32.mrb[19].mxu0 }
0x1179   :  { %2529 = vrcp.f32 %v895_v41 }
0x1183   :  { %v2530_v42 = vpop.eup %2529 }
0x1184   :  { %v899_v45 = vmul.f32 %v2530_v42, %v806_v58 }
0x11e7   :  { %v902_v43 = vpop.permute.xlu0 %901 }
0x11e8   :  { %v904_v44 = vmul.f32 %v2530_v42, %v902_v43 }
0x11ea   :  { %906 = vrot.lane.b32.xlu1 %v904_v44, %s2634_s3 }
0x125c   :  { %v907_v46 = vpop.permute.xlu1 %906 }
0x125d   :  { %v2889_v47 = vadd.f32 %v907_v46, %v899_v45 }
0x125f   :  { %2531 = vtanh.f32 %v2889_v47 }
0x1269   :  { %v2532_v48 = vpop.eup %2531 }
0x126a   :  { %912 = vrot.lane.b32.xlu0 %v2532_v48, %s2633_s13 }
0x12dc   :  { %v913_v55 = vpop.permute.xlu0 %912 }
0x12dd   :  { %v915_v56 = vmul.f32 %v2530_v42, %v913_v55 }
0x12df   :  { %917 = vrot.lane.b32.xlu1 %v915_v56, %s2634_s3 }
0x1351   :  { %v918_v57 = vpop.permute.xlu1 %917 }
0x1352   :  { %921 = vst.msk [vmem:[#allocation2 + $0x30] sm:$0xff] %vm200_vm3, %v918_v57  ;;  %2256 = vmatmul.mubr.msk.f32.vlgmr.msra.gmra.mrb[8].mxu1 %vm200_vm3, %v918_v57 }
0x1353   :  { %2424 = vmatpush3.bf16.msra.mxu1 %v2899_v51  ;;  %2286 = vmatprep.mubr.msk.f32.mxu1 %vm2631_vm0, %v2632_v2 }
0x1354   :  { %2425 = vmatprep.subr.bf16.mxu1 %v2630_v1 }
0x1357   :  { %2427 = vmatpush3.bf16.msra.mxu1 %v2909_v54 }
0x1358   :  { %2428 = vmatprep.subr.bf16.mxu1 %v2630_v1 }
0x1359   :  { %v1040_v59 = vld [vmem:[#allocation2 + $0x30] sm:$0xff] }
0x135a   :  { %2287 = vmatmul.mubr.f32.vlgmr.msra.gmra.mrb[10].mxu1 %v2632_v2  ;;  %2275 = vmatprep.mubr.msk.f32.mxu0 %vm200_vm3, %v1040_v59 }
0x135b   :  { %2430 = vmatpush3.bf16.msra.mxu1 %v2899_v51  ;;  %2297 = vmatprep.mubr.msk.f32.mxu1 %vm2631_vm0, %v2632_v2 }
0x135c   :  { %2431 = vmatprep.subr.bf16.mxu1 %v2630_v1 }
0x135f   :  { %2433 = vmatpush3.bf16.msra.mxu1 %v2909_v54 }
0x1360   :  { %2440 = vmatprep.subr.bf16.mxu1 %v2630_v1 }
0x1425   :  { %v990_v63 = vpop.f32.mrb[8].mxu1 }
0x1426   :  { %v994_v0 = vadd.f32 %v990_v63, %v197_v62  ;;  %v2257_v3 = vpop.f32.mrb[9].mxu1 }
0x1428   :  { %v2028_v19 = vmul.f32 -1.442695, %v994_v0 }
0x142d   :  { %v1243_v5 = vpop.f32.mrb[10].mxu1 }
0x142e   :  { %v1247_v7 = vadd.f32 %v1243_v5, %v1139_v4  ;;  %v2288_v8 = vpop.f32.mrb[11].mxu1 }
0x1430   :  { %2533 = vtanh.f32 %v1247_v7  ;;  %v2038_v9 = vmul.f32 -1.442695, %v1247_v7 }
0x1432   :  { %2535 = vpow2.f32 %v2038_v9 }
0x143a   :  { %v2534_v11 = vpop.eup %2533 }
0x143b   :  { %1257 = vrot.lane.b32.xlu0 %v2534_v11, %s2633_s13 }
0x143c   :  { %v2536_v13 = vpop.eup %2535 }
0x143d   :  { %v1251_v60 = vadd.f32 1.0, %v2536_v13 }
0x143f   :  { %2537 = vrcp.f32 %v1251_v60 }
0x1449   :  { %v2538_v10 = vpop.eup %2537 }
0x144a   :  { %v1255_v14 = vmul.f32 0.0, %v2538_v10 }
0x14ad   :  { %v1258_v58 = vpop.permute.xlu0 %1257 }
0x14ae   :  { %v1260_v12 = vmul.f32 %v2538_v10, %v1258_v58 }
0x14b0   :  { %1262 = vrot.lane.b32.xlu1 %v1260_v12, %s2634_s3 }
0x1522   :  { %v1263_v15 = vpop.permute.xlu1 %1262 }
0x1523   :  { %v1265_v16 = vadd.f32 %v1263_v15, %v1255_v14 }
0x1525   :  { %2539 = vtanh.f32 %v1265_v16 }
0x1526   :  { %2541 = vtanh.f32 %v994_v0  ;;  %v1149_v0 = vadd.f32 %v2935_v6, %v2881_v37 }
0x1527   :  { %2543 = vpow2.f32 %v2028_v19 }
0x152f   :  { %v2540_v17 = vpop.eup %2539 }
0x1530   :  { %1268 = vrot.lane.b32.xlu0 %v2540_v17, %s2633_s13  ;;  %v2542_v18 = vpop.eup %2541 }
0x1531   :  { %v2544_v20 = vpop.eup %2543 }
0x1532   :  { %v998_v21 = vadd.f32 1.0, %v2544_v20 }
0x1534   :  { %1004 = vrot.lane.b32.xlu0 %v2542_v18, %s2633_s13  ;;  %2545 = vrcp.f32 %v998_v21  ;;  %v1154_v18 = vadd.f32 %v2879_v35, %v2935_v6 }
0x153e   :  { %v2546_v24 = vpop.eup %2545 }
0x153f   :  { %v1002_v28 = vmul.f32 %v2546_v24, %v2889_v47 }
0x15a2   :  { %v1269_v22 = vpop.permute.xlu0 %1268 }
0x15a3   :  { %v1271_v23 = vmul.f32 %v2538_v10, %v1269_v22 }
0x15a5   :  { %1273 = vrot.lane.b32.xlu1 %v1271_v23, %s2634_s3 }
0x15a6   :  { %v1005_v25 = vpop.permute.xlu0 %1004 }
0x15a7   :  { %v1007_v26 = vmul.f32 %v2546_v24, %v1005_v25 }
0x15a9   :  { %1009 = vrot.lane.b32.xlu0 %v1007_v26, %s2634_s3 }
0x1617   :  { %v1274_v27 = vpop.permute.xlu1 %1273 }
0x1618   :  { %2298 = vmatmul.mubr.msk.f32.vlgmr.msra.gmra.mrb[12].mxu1 %vm200_vm3, %v1274_v27 }
0x1619   :  { %2442 = vmatpush3.bf16.msra.mxu1 %v2899_v51  ;;  %2319 = vmatprep.mubr.msk.f32.mxu1 %vm2631_vm0, %v2632_v2 }
0x161a   :  { %2443 = vmatprep.subr.bf16.mxu1 %v2630_v1 }
0x161b   :  { %v1010_v29 = vpop.permute.xlu0 %1009 }
0x161c   :  { %v1012_v30 = vadd.f32 %v1010_v29, %v1002_v28 }
0x161d   :  { %2445 = vmatpush3.bf16.msra.mxu1 %v2909_v54 }
0x161e   :  { %2547 = vtanh.f32 %v1012_v30  ;;  %2452 = vmatprep.subr.bf16.mxu1 %v2630_v1 }
0x1628   :  { %v2548_v31 = vpop.eup %2547 }
0x1629   :  { %1015 = vrot.lane.b32.xlu0 %v2548_v31, %s2633_s13 }
0x169b   :  { %v1016_v32 = vpop.permute.xlu0 %1015 }
0x169c   :  { %v1018_v34 = vmul.f32 %v2546_v24, %v1016_v32 }
0x169e   :  { %1020 = vrot.lane.b32.xlu0 %v1018_v34, %s2634_s3 }
0x16eb   :  { %v1343_v40 = vpop.f32.mrb[12].mxu1 }
0x16ec   :  { %v1347_v61 = vadd.f32 %v1343_v40, %v1144_v36  ;;  %v2299_v41 = vpop.f32.mrb[13].mxu1  ;;  %v1159_v40 = vadd.f32 %v2935_v6, %v2886_v39 }
0x16ee   :  { %2549 = vtanh.f32 %v1347_v61  ;;  %v2040_v45 = vmul.f32 -1.442695, %v1347_v61 }
0x16f0   :  { %2551 = vpow2.f32 %v2040_v45 }
0x16f8   :  { %v2550_v42 = vpop.eup %2549 }
0x16f9   :  { %1357 = vrot.lane.b32.xlu1 %v2550_v42, %s2633_s13 }
0x16fa   :  { %v2552_v46 = vpop.eup %2551 }
0x16fb   :  { %v1351_v33 = vadd.f32 1.0, %v2552_v46 }
0x16fd   :  { %2553 = vrcp.f32 %v1351_v33 }
0x1707   :  { %v2554_v47 = vpop.eup %2553 }
0x1708   :  { %v1355_v50 = vmul.f32 %v2554_v47, %v1265_v16 }
0x1710   :  { %v1021_v43 = vpop.permute.xlu0 %1020 }
0x1711   :  { %1024 = vst.msk [vmem:[#allocation2 + $0x38] sm:$0xff] %vm200_vm3, %v1021_v43 }
0x1718   :  { %v1041_v44 = vld [vmem:[#allocation2 + $0x38] sm:$0xff] }
0x1719   :  { %2276 = vmatmul.mubr.msk.f32.gmra.mrb[20].mxu0 %vm200_vm3, %v1041_v44 }
0x171a   :  { %2308 = vmatprep.mubr.msk.f32.mxu0 %vm2631_vm0, %v2632_v2 }
0x176b   :  { %v1358_v48 = vpop.permute.xlu1 %1357 }
0x176c   :  { %v1360_v49 = vmul.f32 %v2554_v47, %v1358_v48 }
0x176e   :  { %1362 = vrot.lane.b32.xlu1 %v1360_v49, %s2634_s3 }
0x17e0   :  { %v1363_v52 = vpop.permute.xlu1 %1362 }
0x17e1   :  { %v1365_v53 = vadd.f32 %v1363_v52, %v1355_v50 }
0x17e3   :  { %2555 = vtanh.f32 %v1365_v53 }
0x17ec   :  { %v2962_v55 = vpop.f32.mrb[20].mxu0 }
0x17ed   :  { %v2556_v56 = vpop.eup %2555  ;;  %v2964_v57 = vpop.f32.mrb[21].mxu0 }
0x17ee   :  { %1368 = vrot.lane.b32.xlu1 %v2556_v56, %s2633_s13 }
0x1860   :  { %v1369_v59 = vpop.permute.xlu1 %1368 }
0x1861   :  { %v1371_v62 = vmul.f32 %v2554_v47, %v1369_v59 }
0x1863   :  { %1373 = vrot.lane.b32.xlu1 %v1371_v62, %s2634_s3  ;;  %v1164_v62 = vadd.f32 %v2884_v38, %v2935_v6 }
0x18d5   :  { %v1374_v63 = vpop.permute.xlu1 %1373 }
0x18d6   :  { %2309 = vmatmul.mubr.msk.f32.vlgmr.msra.gmra.mrb[22].mxu0 %vm200_vm3, %v1374_v63 }
0x18d7   :  { %2448 = vmatpush3.bf16.msra.mxu0 %v2899_v51  ;;  %2330 = vmatprep.mubr.msk.f32.mxu0 %vm2631_vm0, %v2632_v2 }
0x18d8   :  { %2449 = vmatprep.subr.bf16.mxu0 %v2630_v1 }
0x18db   :  { %2451 = vmatpush3.bf16.msra.mxu0 %v2909_v54 }
0x18dc   :  { %2458 = vmatprep.subr.bf16.mxu0 %v2630_v1 }
0x19a9   :  { %v1443_v3 = vpop.f32.mrb[22].mxu0 }
0x19aa   :  { %v1447_v4 = vadd.f32 %v1443_v3, %v1149_v0  ;;  %v2310_v5 = vpop.f32.mrb[23].mxu0 }
0x19ac   :  { %2557 = vtanh.f32 %v1447_v4  ;;  %v2042_v8 = vmul.f32 -1.442695, %v1447_v4 }
0x19ae   :  { %2559 = vpow2.f32 %v2042_v8 }
0x19b6   :  { %v2558_v7 = vpop.eup %2557 }
0x19b7   :  { %1457 = vrot.lane.b32.xlu0 %v2558_v7, %s2633_s13 }
0x19b8   :  { %v2560_v11 = vpop.eup %2559 }
0x19b9   :  { %v1451_v9 = vadd.f32 1.0, %v2560_v11 }
0x19bb   :  { %2561 = vrcp.f32 %v1451_v9 }
0x19c5   :  { %v2562_v13 = vpop.eup %2561 }
0x19c6   :  { %v1455_v58 = vmul.f32 %v2562_v13, %v1365_v53 }
0x1a29   :  { %v1458_v60 = vpop.permute.xlu0 %1457 }
0x1a2a   :  { %v1460_v10 = vmul.f32 %v2562_v13, %v1458_v60 }
0x1a2c   :  { %1462 = vrot.lane.b32.xlu1 %v1460_v10, %s2634_s3 }
0x1a9e   :  { %v1463_v12 = vpop.permute.xlu1 %1462 }
0x1a9f   :  { %v1465_v37 = vadd.f32 %v1463_v12, %v1455_v58  ;;  %v1169_v58 = vadd.f32 %v2935_v6, %v2964_v57 }
0x1aa1   :  { %2563 = vtanh.f32 %v1465_v37 }
0x1aab   :  { %v2564_v14 = vpop.eup %2563 }
0x1aac   :  { %1468 = vrot.lane.b32.xlu0 %v2564_v14, %s2633_s13 }
0x1b1e   :  { %v1469_v15 = vpop.permute.xlu0 %1468 }
0x1b1f   :  { %v1471_v16 = vmul.f32 %v2562_v13, %v1469_v15 }
0x1b21   :  { %1473 = vrot.lane.b32.xlu1 %v1471_v16, %s2634_s3 }
0x1b93   :  { %v1474_v17 = vpop.permute.xlu1 %1473 }
0x1b94   :  { %2320 = vmatmul.mubr.msk.f32.vlgmr.msra.gmra.mrb[14].mxu1 %vm200_vm3, %v1474_v17 }
0x1b95   :  { %2454 = vmatpush3.bf16.msra.mxu1 %v2899_v51  ;;  %2341 = vmatprep.mubr.msk.f32.mxu1 %vm2631_vm0, %v2632_v2 }
0x1b96   :  { %2455 = vmatprep.subr.bf16.mxu1 %v2630_v1 }
0x1b99   :  { %2457 = vmatpush3.bf16.msra.mxu1 %v2909_v54 }
0x1b9a   :  { %2464 = vmatprep.subr.bf16.mxu1 %v2630_v1 }
0x1c67   :  { %v1543_v19 = vpop.f32.mrb[14].mxu1 }
0x1c68   :  { %v1547_v20 = vadd.f32 %v1543_v19, %v1154_v18  ;;  %v2321_v21 = vpop.f32.mrb[15].mxu1 }
0x1c6a   :  { %2565 = vtanh.f32 %v1547_v20  ;;  %v2044_v23 = vmul.f32 -1.442695, %v1547_v20 }
0x1c6c   :  { %2567 = vpow2.f32 %v2044_v23 }
0x1c74   :  { %v2566_v22 = vpop.eup %2565 }
0x1c75   :  { %1557 = vrot.lane.b32.xlu0 %v2566_v22, %s2633_s13 }
0x1c76   :  { %v2568_v24 = vpop.eup %2567 }
0x1c77   :  { %v1551_v25 = vadd.f32 1.0, %v2568_v24 }
0x1c79   :  { %2569 = vrcp.f32 %v1551_v25 }
0x1c83   :  { %v2570_v26 = vpop.eup %2569 }
0x1c84   :  { %v1555_v29 = vmul.f32 %v2570_v26, %v1465_v37 }
0x1ce7   :  { %v1558_v27 = vpop.permute.xlu0 %1557 }
0x1ce8   :  { %v1560_v28 = vmul.f32 %v2570_v26, %v1558_v27 }
0x1cea   :  { %1562 = vrot.lane.b32.xlu1 %v1560_v28, %s2634_s3  ;;  %v1174_v28 = vadd.f32 %v2962_v55, %v2935_v6  ;;  %v2053_v6 = vld [vmem:[%s3046_s7] ss:$0 sm:$0xff] }
0x1d5c   :  { %v1563_v30 = vpop.permute.xlu1 %1562 }
0x1d5d   :  { %v1565_v35 = vadd.f32 %v1563_v30, %v1555_v29 }
0x1d5f   :  { %2571 = vtanh.f32 %v1565_v35 }
0x1d69   :  { %v2572_v31 = vpop.eup %2571 }
0x1d6a   :  { %1568 = vrot.lane.b32.xlu0 %v2572_v31, %s2633_s13 }
0x1ddc   :  { %v1569_v32 = vpop.permute.xlu0 %1568 }
0x1ddd   :  { %v1571_v34 = vmul.f32 %v2570_v26, %v1569_v32 }
0x1ddf   :  { %1573 = vrot.lane.b32.xlu1 %v1571_v34, %s2634_s3 }
0x1e51   :  { %v1574_v36 = vpop.permute.xlu1 %1573 }
0x1e52   :  { %2331 = vmatmul.mubr.msk.f32.vlgmr.msra.gmra.mrb[24].mxu0 %vm200_vm3, %v1574_v36 }
0x1e53   :  { %2460 = vmatpush3.bf16.msra.mxu0 %v2899_v51  ;;  %2352 = vmatprep.mubr.msk.f32.mxu0 %vm2631_vm0, %v2632_v2 }
0x1e54   :  { %2461 = vmatprep.subr.bf16.mxu0 %v2630_v1 }
0x1e57   :  { %2463 = vmatpush3.bf16.msra.mxu0 %v2909_v54 }
0x1f25   :  { %v1643_v61 = vpop.f32.mrb[24].mxu0 }
0x1f26   :  { %v1647_v41 = vadd.f32 %v1643_v61, %v1159_v40  ;;  %v2332_v42 = vpop.f32.mrb[25].mxu0 }
0x1f28   :  { %2573 = vtanh.f32 %v1647_v41  ;;  %v2046_v44 = vmul.f32 -1.442695, %v1647_v41 }
0x1f2a   :  { %2575 = vpow2.f32 %v2046_v44 }
0x1f32   :  { %v2574_v43 = vpop.eup %2573 }
0x1f33   :  { %1657 = vrot.lane.b32.xlu0 %v2574_v43, %s2633_s13 }
0x1f34   :  { %v2576_v45 = vpop.eup %2575 }
0x1f35   :  { %v1651_v46 = vadd.f32 1.0, %v2576_v45 }
0x1f37   :  { %2577 = vrcp.f32 %v1651_v46 }
0x1f41   :  { %v2578_v33 = vpop.eup %2577 }
0x1f42   :  { %v1655_v49 = vmul.f32 %v2578_v33, %v1565_v35 }
0x1fa5   :  { %v1658_v47 = vpop.permute.xlu0 %1657 }
0x1fa6   :  { %v1660_v48 = vmul.f32 %v2578_v33, %v1658_v47 }
0x1fa8   :  { %1662 = vrot.lane.b32.xlu1 %v1660_v48, %s2634_s3 }
0x201a   :  { %v1663_v50 = vpop.permute.xlu1 %1662 }
0x201b   :  { %v1665_v39 = vadd.f32 %v1663_v50, %v1655_v49  ;;  %v2054_v50 = vld [vmem:[#allocation3] ss:$0 sm:$0xff] }
0x201d   :  { %2579 = vtanh.f32 %v1665_v39 }
0x2027   :  { %v2580_v52 = vpop.eup %2579 }
0x2028   :  { %1668 = vrot.lane.b32.xlu0 %v2580_v52, %s2633_s13 }
0x209a   :  { %v1669_v53 = vpop.permute.xlu0 %1668 }
0x209b   :  { %v1671_v56 = vmul.f32 %v2578_v33, %v1669_v53 }
0x209d   :  { %1673 = vrot.lane.b32.xlu1 %v1671_v56, %s2634_s3 }
0x210f   :  { %v1674_v59 = vpop.permute.xlu1 %1673 }
0x2110   :  { %2342 = vmatmul.mubr.msk.f32.vlgmr.msra.gmra.mrb[16].mxu1 %vm200_vm3, %v1674_v59 }
0x2111   :  { %2466 = vmatpush3.bf16.msra.mxu1 %v2899_v51  ;;  %2363 = vmatprep.mubr.msk.f32.mxu1 %vm2631_vm0, %v2632_v2 }
0x2112   :  { %2467 = vmatprep.subr.bf16.mxu1 %v2630_v1 }
0x2115   :  { %2469 = vmatpush3.bf16.msra.mxu1 %v2909_v54 }
0x21e3   :  { %v1743_v63 = vpop.f32.mrb[16].mxu1 }
0x21e4   :  { %v1747_v0 = vadd.f32 %v1743_v63, %v1164_v62  ;;  %v2343_v3 = vpop.f32.mrb[17].mxu1 }
0x21e6   :  { %2581 = vtanh.f32 %v1747_v0  ;;  %v2048_v5 = vmul.f32 -1.442695, %v1747_v0 }
0x21e8   :  { %2583 = vpow2.f32 %v2048_v5 }
0x21f0   :  { %v2582_v4 = vpop.eup %2581 }
0x21f1   :  { %1757 = vrot.lane.b32.xlu0 %v2582_v4, %s2633_s13 }
0x21f2   :  { %v2584_v51 = vpop.eup %2583 }
0x21f3   :  { %v1751_v7 = vadd.f32 1.0, %v2584_v51 }
0x21f5   :  { %2585 = vrcp.f32 %v1751_v7 }
0x21ff   :  { %v2586_v2 = vpop.eup %2585 }
0x2200   :  { %v1755_v54 = vmul.f32 %v2586_v2, %v1665_v39 }
0x2263   :  { %v1758_v8 = vpop.permute.xlu0 %1757 }
0x2264   :  { %v1760_v1 = vmul.f32 %v2586_v2, %v1758_v8 }
0x2266   :  { %1762 = vrot.lane.b32.xlu1 %v1760_v1, %s2634_s3 }
0x22d8   :  { %v1763_v11 = vpop.permute.xlu1 %1762 }
0x22d9   :  { %v1765_v38 = vadd.f32 %v1763_v11, %v1755_v54 }
0x22db   :  { %2587 = vtanh.f32 %v1765_v38 }
0x22e5   :  { %v2588_v9 = vpop.eup %2587 }
0x22e6   :  { %1768 = vrot.lane.b32.xlu0 %v2588_v9, %s2633_s13 }
0x2358   :  { %v1769_v13 = vpop.permute.xlu0 %1768 }
0x2359   :  { %v1771_v60 = vmul.f32 %v2586_v2, %v1769_v13 }
0x235b   :  { %1773 = vrot.lane.b32.xlu1 %v1771_v60, %s2634_s3 }
0x23cd   :  { %v1774_v10 = vpop.permute.xlu1 %1773 }
0x23ce   :  { %2353 = vmatmul.mubr.msk.f32.vlgmr.msra.gmra.mrb[26].mxu0 %vm200_vm3, %v1774_v10 }
0x24a1   :  { %v1843_v12 = vpop.f32.mrb[26].mxu0 }
0x24a2   :  { %v1847_v37 = vadd.f32 %v1843_v12, %v1169_v58  ;;  %v2354_v14 = vpop.f32.mrb[27].mxu0 }
0x24a4   :  { %2589 = vtanh.f32 %v1847_v37  ;;  %v2050_v16 = vmul.f32 -1.442695, %v1847_v37 }
0x24a6   :  { %2591 = vpow2.f32 %v2050_v16 }
0x24ae   :  { %v2590_v15 = vpop.eup %2589 }
0x24af   :  { %1857 = vrot.lane.b32.xlu0 %v2590_v15, %s2633_s13 }
0x24b0   :  { %v2592_v17 = vpop.eup %2591 }
0x24b1   :  { %v1851_v18 = vadd.f32 1.0, %v2592_v17 }
0x24b3   :  { %2593 = vrcp.f32 %v1851_v18 }
0x24bd   :  { %v2594_v19 = vpop.eup %2593 }
0x24be   :  { %v1855_v22 = vmul.f32 %v2594_v19, %v1765_v38 }
0x2521   :  { %v1858_v20 = vpop.permute.xlu0 %1857 }
0x2522   :  { %v1860_v21 = vmul.f32 %v2594_v19, %v1858_v20 }
0x2524   :  { %1862 = vrot.lane.b32.xlu1 %v1860_v21, %s2634_s3 }
0x2596   :  { %v1863_v23 = vpop.permute.xlu1 %1862 }
0x2597   :  { %v1865_v57 = vadd.f32 %v1863_v23, %v1855_v22 }
0x2599   :  { %2595 = vtanh.f32 %v1865_v57 }
0x25a3   :  { %v2596_v24 = vpop.eup %2595 }
0x25a4   :  { %1868 = vrot.lane.b32.xlu0 %v2596_v24, %s2633_s13 }
0x2616   :  { %v1869_v25 = vpop.permute.xlu0 %1868 }
0x2617   :  { %v1871_v26 = vmul.f32 %v2594_v19, %v1869_v25 }
0x2619   :  { %1873 = vrot.lane.b32.xlu1 %v1871_v26, %s2634_s3 }
0x268b   :  { %v1874_v27 = vpop.permute.xlu1 %1873 }
0x268c   :  { %2364 = vmatmul.mubr.msk.f32.vlgmr.msra.gmra.mrb[18].mxu1 %vm200_vm3, %v1874_v27 }
0x275f   :  { %v1943_v29 = vpop.f32.mrb[18].mxu1 }
0x2760   :  { %v1947_v30 = vadd.f32 %v1943_v29, %v1174_v28  ;;  %v2365_v35 = vpop.f32.mrb[19].mxu1 }
0x2762   :  { %2597 = vtanh.f32 %v1947_v30  ;;  %v2052_v32 = vmul.f32 -1.442695, %v1947_v30 }
0x2764   :  { %2599 = vpow2.f32 %v2052_v32 }
0x276c   :  { %v2598_v31 = vpop.eup %2597 }
0x276d   :  { %1957 = vrot.lane.b32.xlu0 %v2598_v31, %s2633_s13 }
0x276e   :  { %v2600_v34 = vpop.eup %2599 }
0x276f   :  { %v1951_v36 = vadd.f32 1.0, %v2600_v34 }
0x2771   :  { %2601 = vrcp.f32 %v1951_v36 }
0x277b   :  { %v2602_v40 = vpop.eup %2601 }
0x277c   :  { %v1955_v55 = vmul.f32 %v2602_v40, %v1865_v57 }
0x27df   :  { %v1958_v61 = vpop.permute.xlu0 %1957 }
0x27e0   :  { %v1960_v41 = vmul.f32 %v2602_v40, %v1958_v61 }
0x27e2   :  { %1962 = vrot.lane.b32.xlu1 %v1960_v41, %s2634_s3 }
0x27e6   :  { %1978 = vrot.lane.b32.xlu1 %v2053_v6, %s2635_s19 }
0x2854   :  { %v1963_v42 = vpop.permute.xlu1 %1962 }
0x2855   :  { %v1965_v43 = vadd.f32 %v1963_v42, %v1955_v55 }
0x2857   :  { %2603 = vtanh.f32 %v1965_v43 }
0x2858   :  { %v1979_v46 = vpop.permute.xlu1 %1978 }
0x2861   :  { %v2604_v44 = vpop.eup %2603 }
0x2862   :  { %1968 = vrot.lane.b32.xlu0 %v2604_v44, %s2633_s13 }
0x28d4   :  { %v1969_v45 = vpop.permute.xlu0 %1968 }
0x28d5   :  { %v1971_v33 = vmul.f32 %v2602_v40, %v1969_v45 }
0x28d7   :  { %v1981_v47 = vmul.f32 %v1979_v46, %v1971_v33 }
0x28d9   :  { %1983 = vrot.lane.b32.xlu0 %v1981_v47, %s2634_s3 }
0x294b   :  { %v1984_v48 = vpop.permute.xlu0 %1983 }
0x294c   :  { %v1986_v49 = vsel %vm200_vm3, %v1984_v48, 0.0 }
0x294d   :  { %1987 = vadd.xlane.f32.xlu1 %v1986_v49 }
0x29da   :  { %v1988_v39 = vpop.xlane.xlu1 %1987 }
0x29db   :  { %v1996_v52 = vadd.f32 %v2054_v50, %v1988_v39 }
0x29dd   :  { %1998 = vst.msk [vmem:[%s3048_s9] sm:$0xff] %vm1997_vm4, %v1996_v52 }
0x29de   :  { %2003 = vsyncpa [#allocation5], 1 }

</bundles_post_ra>
